<compile_context>
chip_gen: v7x
topology: tpu7x:2x2x1
jax: 0.10.0
libtpu: 0.0.40
codegen_flags: <defaults>
</compile_context>

<pallas_src>
import jax
import jax.numpy as jnp
from jax import lax
from jax.experimental import pallas as pl
from jax.experimental.pallas import tpu as pltpu

K_HOPS = 2          # DGL TAGConv default k=2
_SUBLANE = 8
_LANE = 128


def _round_up(x, m):
    return ((x + m - 1) // m) * m


def pack_params(params, node_emb_size, graph_emb_size):
    """Pack all weights / per-channel vectors into one zero-padded f32 buffer.

    Done once at parameter-load time so the kernel issues a single parameter
    DMA.  Every sub-block (wg, each per-hop block of w1/w2, wd, and every
    1-row vector) starts at an 8-row (sublane-tile) aligned offset, and all
    feature widths are padded to multiples of 8, so every in-kernel slice is
    tile-aligned.  Lane width is padded to a multiple of 128 so the final
    store is lane-dense.
    """
    l0 = params['wg'].shape[1]
    l1 = params['w1'].shape[1]
    nep = _round_up(node_emb_size, _SUBLANE)
    l0p = _round_up(l0, _SUBLANE)
    l1p = _round_up(l1, _SUBLANE)
    lane_pad = _round_up(max(graph_emb_size, _LANE), _LANE)

    meta = dict(ne=node_emb_size, nep=nep, l0=l0, l0p=l0p, l1=l1, l1p=l1p,
                ges=graph_emb_size, lane_pad=lane_pad)
    r = 0
    meta['r_wg'] = r;   r += nep
    meta['r_w1'] = r;   r += (K_HOPS + 1) * l0p
    meta['r_w2'] = r;   r += (K_HOPS + 1) * l1p
    meta['r_wd'] = r;   r += l1p
    meta['r_bg'] = r;   r += _SUBLANE
    meta['r_bn1s'] = r; r += _SUBLANE
    meta['r_bn1b'] = r; r += _SUBLANE
    meta['r_bn2s'] = r; r += _SUBLANE
    meta['r_bn2b'] = r; r += _SUBLANE
    meta['r_bd'] = r;   r += _SUBLANE
    n_rows = _round_up(r, _SUBLANE)
    meta['n_rows'] = n_rows

    p = jnp.zeros((n_rows, lane_pad), jnp.float32)
    p = p.at[meta['r_wg']:meta['r_wg'] + node_emb_size, :l0].set(params['wg'])
    for hop in range(K_HOPS + 1):
        p = p.at[meta['r_w1'] + hop * l0p:
                 meta['r_w1'] + hop * l0p + l0, :l1].set(
            params['w1'][hop * l0:(hop + 1) * l0, :])
        p = p.at[meta['r_w2'] + hop * l1p:
                 meta['r_w2'] + hop * l1p + l1, :l1].set(
            params['w2'][hop * l1:(hop + 1) * l1, :])
    p = p.at[meta['r_wd']:meta['r_wd'] + l1, :graph_emb_size].set(params['wd'])
    p = p.at[meta['r_bg'], :l0].set(params['bg'].reshape(-1))
    p = p.at[meta['r_bn1s'], :l1].set(params['bn1_scale'].reshape(-1))
    p = p.at[meta['r_bn1b'], :l1].set(params['bn1_shift'].reshape(-1))
    p = p.at[meta['r_bn2s'], :l1].set(params['bn2_scale'].reshape(-1))
    p = p.at[meta['r_bn2b'], :l1].set(params['bn2_shift'].reshape(-1))
    p = p.at[meta['r_bd'], :graph_emb_size].set(params['bd'].reshape(-1))
    return p, meta


def _make_kernel(meta, n_nodes, np_, gb):
    """Kernel processing `gb` graphs of `np_` (padded) nodes per grid step."""
    nep, l0p, l1p = meta['nep'], meta['l0p'], meta['l1p']
    r_wg, r_w1, r_w2, r_wd = meta['r_wg'], meta['r_w1'], meta['r_w2'], meta['r_wd']
    r_bg, r_bd = meta['r_bg'], meta['r_bd']
    r_bn1s, r_bn1b = meta['r_bn1s'], meta['r_bn1b']
    r_bn2s, r_bn2b = meta['r_bn2s'], meta['r_bn2b']
    rows = gb * np_
    inv_n = 1.0 / float(n_nodes)

    def kernel(feat_ref, adj_ref, p_ref, out_ref):
        feat3 = feat_ref[...]                                  # (gb, np_, nep)
        adj = adj_ref[...]                                     # (gb, np_, np_)
        feat = feat3.reshape(rows, nep)                        # layout no-op

        # --- in-degree symmetric normalization; applied per hop as a column
        #     broadcast (no transpose / identity-matrix trick) ---
        deg = jnp.sum(adj, axis=2, keepdims=True)              # (gb, np_, 1)
        norm = lax.rsqrt(jnp.maximum(deg, 1.0))

        # --- node gating for all gb*np_ rows in one MXU matmul ---
        h = jax.nn.sigmoid(
            jnp.dot(feat, p_ref[r_wg:r_wg + nep, :l0p],
                    preferred_element_type=jnp.float32)
            + p_ref[r_bg:r_bg + 1, :l0p])                      # (rows, l0p)
        # (padded feature columns carry sigmoid(0)=0.5 garbage; the padded rows
        #  of every downstream weight block are zero, so it never contributes.)

        # --- TAGConv(k=2, bias=False) -> folded BatchNorm1d -> ReLU ---
        def tag_bn_relu(h2, f_in, f_out, r_w, r_s, r_b):
            h3 = h2.reshape(gb, np_, f_in)
            # per-graph propagation, batched over gb on the MXU
            hop1 = norm * jnp.einsum('gij,gjf->gif', adj, norm * h3,
                                     preferred_element_type=jnp.float32)
            hop2 = norm * jnp.einsum('gij,gjf->gif', adj, norm * hop1,
                                     preferred_element_type=jnp.float32)
            # concat([h, hop1, hop2], -1) @ W == sum of per-hop block matmuls
            out = jnp.dot(h2, p_ref[r_w:r_w + f_in, :f_out],
                          preferred_element_type=jnp.float32)
            out = out + jnp.dot(hop1.reshape(rows, f_in),
                                p_ref[r_w + f_in:r_w + 2 * f_in, :f_out],
                                preferred_element_type=jnp.float32)
            out = out + jnp.dot(hop2.reshape(rows, f_in),
                                p_ref[r_w + 2 * f_in:r_w + 3 * f_in, :f_out],
                                preferred_element_type=jnp.float32)
            out = out * p_ref[r_s:r_s + 1, :f_out] + p_ref[r_b:r_b + 1, :f_out]
            return jnp.maximum(out, 0.0)

        h = tag_bn_relu(h, l0p, l1p, r_w1, r_bn1s, r_bn1b)
        h = tag_bn_relu(h, l1p, l1p, r_w2, r_bn2s, r_bn2b)

        # --- masked mean over the real nodes of each graph, fused BEFORE the
        #     final affine layer (mean commutes with it) ---
        h3 = h.reshape(gb, np_, l1p)
        valid = (lax.broadcasted_iota(jnp.int32, (gb, np_, 1), 1)
                 < n_nodes).astype(jnp.float32)
        hm = jnp.sum(h3 * valid, axis=1) * inv_n               # (gb, l1p)

        out_ref[...] = (jnp.dot(hm, p_ref[r_wd:r_wd + l1p, :],
                                preferred_element_type=jnp.float32)
                        + p_ref[r_bd:r_bd + 1, :])             # (gb, lane_pad)
    return kernel


def graph_embed_forward_batched(feat, adj, ppack, meta):
    """Embed G graphs (same node count N) in one pallas_call.

    feat: (G, N, node_emb_size)   adj: (G, N, N), adj[g,i,j]=1 iff edge j->i.
    Returns (G, graph_emb_size).
    """
    g_total, n, ne = feat.shape
    assert ne == meta['ne']
    ges = meta['ges']
    if g_total == 0:
        return jnp.zeros((0, ges), jnp.float32)
    if n == 0:
        # per original module: unknown/empty graph -> ones embedding
        return jnp.ones((g_total, ges), jnp.float32)

    np_ = _round_up(n, _SUBLANE)
    # Graphs per grid step: fill ~128 sublane rows for the shared-weight
    # matmuls, keep GB a multiple of 8 so the (GB, 128) output block is
    # full-tile.  Adjacency stays per-graph -> VMEM per step is O(GB*N^2).
    gb = max(_SUBLANE, (128 // np_) // _SUBLANE * _SUBLANE)
    g_pad = _round_up(g_total, gb)

    featp = jnp.zeros((g_pad, np_, meta['nep']), jnp.float32)
    featp = featp.at[:g_total, :n, :ne].set(feat.astype(jnp.float32))
    adjp = jnp.zeros((g_pad, np_, np_), jnp.float32)
    adjp = adjp.at[:g_total, :n, :n].set(adj.astype(jnp.float32))

    out = pl.pallas_call(
        _make_kernel(meta, n, np_, gb),
        out_shape=jax.ShapeDtypeStruct((g_pad, meta['lane_pad']), jnp.float32),
        grid_spec=pltpu.PrefetchScalarGridSpec(
            num_scalar_prefetch=0,
            grid=(g_pad // gb,),
            in_specs=[
                pl.BlockSpec((gb, np_, meta['nep']), lambda g: (g, 0, 0)),
                pl.BlockSpec((gb, np_, np_), lambda g: (g, 0, 0)),
                # constant block index -> parameter pack is DMA'd once and
                # stays resident in VMEM across all grid steps.
                pl.BlockSpec((meta['n_rows'], meta['lane_pad']),
                             lambda g: (0, 0)),
            ],
            out_specs=pl.BlockSpec((gb, meta['lane_pad']), lambda g: (g, 0)),
        ),
        compiler_params=pltpu.CompilerParams(
            dimension_semantics=("parallel",)),
    )(featp, adjp, ppack)
    return out[:g_total, :ges]


def graph_embed_forward(feat, adj, ppack, meta):
    """Single-graph forward.  Returns (graph_emb_size,) for both branches."""
    n = feat.shape[0]
    ges = meta['ges']
    if n == 0:
        # torch buffer is ones(1, ges); return the squeezed form so the rank
        # matches the normal path (h.mean(0)).
        return jnp.ones((ges,), jnp.float32)
    return graph_embed_forward_batched(feat[None], adj[None], ppack, meta)[0]


def _reference(feat, adj, params):
    """Pure-JAX reference matching the original torch/DGL forward (one graph)."""
    hp = lax.Precision.HIGHEST
    deg = jnp.clip(jnp.sum(adj, axis=1, keepdims=True), 1.0, None)
    norm = lax.rsqrt(deg)
    h = jax.nn.sigmoid(jnp.dot(feat, params['wg'], precision=hp) + params['bg'])
    for w, s, b in ((params['w1'], params['bn1_scale'], params['bn1_shift']),
                    (params['w2'], params['bn2_scale'], params['bn2_shift'])):
        fstack = [h]
        cur = h
        for _ in range(K_HOPS):
            cur = norm * jnp.dot(adj, cur * norm, precision=hp)
            fstack.append(cur)
        h = jnp.dot(jnp.concatenate(fstack, axis=-1), w, precision=hp)
        h = h * s + b
        h = jnp.maximum(h, 0.0)
    h = jnp.dot(h, params['wd'], precision=hp) + params['bd']
    return jnp.mean(h, axis=0)


if __name__ == "__main__":
    key = jax.random.PRNGKey(0)
    keys = jax.random.split(key, 20)

    G = 48                     # number of graphs (batched embedding)
    N = 8                      # nodes per graph
    node_emb_size = 16
    graph_emb_size = 32
    size_layers = (7, 7)
    eps = 1e-5

    # node features (g.ndata['gem_hv']) for every graph
    feat = jax.random.normal(keys[0], (G, N, node_emb_size), jnp.float32)

    # deterministic batch of random undirected 0/1 adjacencies (no self loops)
    a = jax.random.uniform(keys[15], (G, N, N)) < 0.35
    a = jnp.logical_or(a, jnp.transpose(a, (0, 2, 1)))
    eye = jnp.eye(N, dtype=bool)[None]
    adj = jnp.where(eye, 0.0, a.astype(jnp.float32))

    def lin_w(k, fan_in, fan_out):
        return 0.1 * jax.random.normal(k, (fan_in, fan_out), jnp.float32)

    def bn_fold(kg, kb, km, kv, c):
        gamma = 1.0 + 0.1 * jax.random.normal(kg, (1, c), jnp.float32)
        beta = 0.1 * jax.random.normal(kb, (1, c), jnp.float32)
        mean = 0.1 * jax.random.normal(km, (1, c), jnp.float32)
        var = jnp.abs(1.0 + 0.1 * jax.random.normal(kv, (1, c), jnp.float32))
        scale = gamma * lax.rsqrt(var + eps)
        shift = beta - mean * scale
        return scale, shift

    l0, l1 = size_layers
    params = {}
    # node gating Linear(node_emb_size -> l0)
    params['wg'] = lin_w(keys[1], node_emb_size, l0)
    params['bg'] = 0.1 * jax.random.normal(keys[2], (1, l0), jnp.float32)
    # TAGConv linears (in_feats*(K+1) -> out_feats), bias=False (use_batch_norm=True)
    params['w1'] = lin_w(keys[3], l0 * (K_HOPS + 1), l1)
    params['w2'] = lin_w(keys[4], l1 * (K_HOPS + 1), size_layers[1])
    # BatchNorm1d params folded (eval mode)
    params['bn1_scale'], params['bn1_shift'] = bn_fold(keys[5], keys[6], keys[7], keys[8], l1)
    params['bn2_scale'], params['bn2_shift'] = bn_fold(keys[9], keys[10], keys[11], keys[12],
                                                       size_layers[1])
    # final dense Linear(size_layers[-1] -> graph_emb_size)
    params['wd'] = lin_w(keys[13], size_layers[-1], graph_emb_size)
    params['bd'] = 0.1 * jax.random.normal(keys[14], (1, graph_emb_size), jnp.float32)

    # one-time host-side packing into a single tile-aligned, DMA-friendly buffer
    ppack, meta = pack_params(params, node_emb_size, graph_emb_size)

    # batched forward: 48 graphs, 16 graphs / grid step (128-row tiles), 3 steps
    out = jax.block_until_ready(graph_embed_forward_batched(feat, adj, ppack, meta))
    assert out.shape == (G, graph_emb_size)
    assert bool(jnp.all(jnp.isfinite(out)))

    ref = jax.block_until_ready(
        jax.vmap(lambda f, a: _reference(f, a, params))(feat, adj))
    assert jnp.allclose(out, ref, rtol=1e-2, atol=1e-2), (out, ref)

    # single-graph path (same kernel) and empty-graph branch (consistent rank)
    out1 = jax.block_until_ready(graph_embed_forward(feat[0], adj[0], ppack, meta))
    assert out1.shape == (graph_emb_size,)
    assert jnp.allclose(out1, ref[0], rtol=1e-2, atol=1e-2)
    out_empty = graph_embed_forward(jnp.zeros((0, node_emb_size), jnp.float32),
                                    jnp.zeros((0, 0), jnp.float32), ppack, meta)
    assert out_empty.shape == (graph_emb_size,)

    print("KERNEL_OK")
</pallas_src>

<mosaic_0001>
module attributes {stable_mosaic.version = 11 : i64} {
  func.func @kernel(%arg0: i32, %arg1: memref<16x8x16xf32, #tpu.memory_space<vmem>>, %arg2: memref<16x8x8xf32, #tpu.memory_space<vmem>>, %arg3: memref<120x128xf32, #tpu.memory_space<vmem>>, %arg4: memref<16x128xf32, #tpu.memory_space<vmem>>) attributes {dimension_semantics = [#tpu.dimension_semantics<parallel>], iteration_bounds = array<i64: 3>, scalar_prefetch = 0 : i64, scratch_operands = 0 : i64, tpu.core_type = #tpu.core_type<tc>, window_params = [{transform_indices = @transform_0, window_bounds = array<i64: 16, 8, 16>}, {transform_indices = @transform_1, window_bounds = array<i64: 16, 8, 8>}, {pipeline_mode = #tpu.pipeline_mode<synchronous>, transform_indices = @transform_2, window_bounds = array<i64: 120, 128>}, {transform_indices = @transform_3, window_bounds = array<i64: 16, 128>}]} {
    %c0 = arith.constant 0 : index
    %c0_0 = arith.constant 0 : index
    %c0_1 = arith.constant 0 : index
    %0 = vector.load %arg1[%c0, %c0_0, %c0_1] : memref<16x8x16xf32, #tpu.memory_space<vmem>>, vector<16x8x16xf32>
    %c0_2 = arith.constant 0 : index
    %c0_3 = arith.constant 0 : index
    %c0_4 = arith.constant 0 : index
    %1 = vector.load %arg2[%c0_2, %c0_3, %c0_4] : memref<16x8x8xf32, #tpu.memory_space<vmem>>, vector<16x8x8xf32>
    %2 = vector.shape_cast %0 : vector<16x8x16xf32> to vector<128x16xf32>
    %cst = arith.constant dense<0.000000e+00> : vector<16x8xf32>
    %3 = vector.multi_reduction <add>, %1, %cst [2] : vector<16x8x8xf32> to vector<16x8xf32>
    %4 = vector.shape_cast %3 : vector<16x8xf32> to vector<16x8x1xf32>
    %cst_5 = arith.constant 1.000000e+00 : f32
    %5 = vector.broadcast %cst_5 : f32 to vector<16x8x1xf32>
    %6 = arith.maximumf %4, %5 : vector<16x8x1xf32>
    %7 = math.rsqrt %6 : vector<16x8x1xf32>
    %c0_6 = arith.constant 0 : index
    %c0_7 = arith.constant 0 : index
    %8 = vector.load %arg3[%c0_6, %c0_7] : memref<120x128xf32, #tpu.memory_space<vmem>>, vector<16x8xf32>
    %cst_8 = arith.constant dense<0.000000e+00> : vector<128x8xf32>
    %9 = tpu.matmul %2, %8, %cst_8 {dimension_numbers = #tpu.dot_dimension_numbers<[1], [0], [0], [1], [0, 0, 1, 1], [], []>} : vector<128x16xf32>, vector<16x8xf32>, vector<128x8xf32> -> vector<128x8xf32>
    %c72 = arith.constant 72 : index
    %c0_9 = arith.constant 0 : index
    %10 = vector.load %arg3[%c72, %c0_9] : memref<120x128xf32, #tpu.memory_space<vmem>>, vector<1x8xf32>
    %11 = vector.broadcast %10 : vector<1x8xf32> to vector<128x8xf32>
    %12 = arith.addf %9, %11 : vector<128x8xf32>
    %13 = arith.negf %12 : vector<128x8xf32>
    %14 = math.exp %13 : vector<128x8xf32>
    %cst_10 = arith.constant 1.000000e+00 : f32
    %15 = vector.broadcast %cst_10 : f32 to vector<128x8xf32>
    %16 = arith.addf %15, %14 : vector<128x8xf32>
    %17 = arith.divf %15, %16 : vector<128x8xf32>
    %18 = vector.shape_cast %17 : vector<128x8xf32> to vector<16x8x8xf32>
    %19 = vector.broadcast %7 : vector<16x8x1xf32> to vector<16x8x8xf32>
    %20 = arith.mulf %19, %18 : vector<16x8x8xf32>
    "tpu.trace_start"() <{level = 10 : i32, message = "gij,gjf->gif"}> : () -> ()
    %cst_11 = arith.constant dense<0.000000e+00> : vector<16x8x8xf32>
    %21 = tpu.matmul %1, %20, %cst_11 {dimension_numbers = #tpu.dot_dimension_numbers<[2], [1], [1], [2], [0, 0, 0, 1, 1, 2], [0], [0]>} : vector<16x8x8xf32>, vector<16x8x8xf32>, vector<16x8x8xf32> -> vector<16x8x8xf32>
    "tpu.trace_stop"() : () -> ()
    %22 = vector.broadcast %7 : vector<16x8x1xf32> to vector<16x8x8xf32>
    %23 = arith.mulf %22, %21 : vector<16x8x8xf32>
    %24 = vector.broadcast %7 : vector<16x8x1xf32> to vector<16x8x8xf32>
    %25 = arith.mulf %24, %23 : vector<16x8x8xf32>
    "tpu.trace_start"() <{level = 10 : i32, message = "gij,gjf->gif"}> : () -> ()
    %cst_12 = arith.constant dense<0.000000e+00> : vector<16x8x8xf32>
    %26 = tpu.matmul %1, %25, %cst_12 {dimension_numbers = #tpu.dot_dimension_numbers<[2], [1], [1], [2], [0, 0, 0, 1, 1, 2], [0], [0]>} : vector<16x8x8xf32>, vector<16x8x8xf32>, vector<16x8x8xf32> -> vector<16x8x8xf32>
    "tpu.trace_stop"() : () -> ()
    %27 = vector.broadcast %7 : vector<16x8x1xf32> to vector<16x8x8xf32>
    %28 = arith.mulf %27, %26 : vector<16x8x8xf32>
    %c16 = arith.constant 16 : index
    %c0_13 = arith.constant 0 : index
    %29 = vector.load %arg3[%c16, %c0_13] : memref<120x128xf32, #tpu.memory_space<vmem>>, vector<8x8xf32>
    %cst_14 = arith.constant dense<0.000000e+00> : vector<128x8xf32>
    %30 = tpu.matmul %17, %29, %cst_14 {dimension_numbers = #tpu.dot_dimension_numbers<[1], [0], [0], [1], [0, 0, 1, 1], [], []>} : vector<128x8xf32>, vector<8x8xf32>, vector<128x8xf32> -> vector<128x8xf32>
    %31 = vector.shape_cast %23 : vector<16x8x8xf32> to vector<128x8xf32>
    %c24 = arith.constant 24 : index
    %c0_15 = arith.constant 0 : index
    %32 = vector.load %arg3[%c24, %c0_15] : memref<120x128xf32, #tpu.memory_space<vmem>>, vector<8x8xf32>
    %cst_16 = arith.constant dense<0.000000e+00> : vector<128x8xf32>
    %33 = tpu.matmul %31, %32, %cst_16 {dimension_numbers = #tpu.dot_dimension_numbers<[1], [0], [0], [1], [0, 0, 1, 1], [], []>} : vector<128x8xf32>, vector<8x8xf32>, vector<128x8xf32> -> vector<128x8xf32>
    %34 = arith.addf %30, %33 : vector<128x8xf32>
    %35 = vector.shape_cast %28 : vector<16x8x8xf32> to vector<128x8xf32>
    %c32 = arith.constant 32 : index
    %c0_17 = arith.constant 0 : index
    %36 = vector.load %arg3[%c32, %c0_17] : memref<120x128xf32, #tpu.memory_space<vmem>>, vector<8x8xf32>
    %cst_18 = arith.constant dense<0.000000e+00> : vector<128x8xf32>
    %37 = tpu.matmul %35, %36, %cst_18 {dimension_numbers = #tpu.dot_dimension_numbers<[1], [0], [0], [1], [0, 0, 1, 1], [], []>} : vector<128x8xf32>, vector<8x8xf32>, vector<128x8xf32> -> vector<128x8xf32>
    %38 = arith.addf %34, %37 : vector<128x8xf32>
    %c80 = arith.constant 80 : index
    %c0_19 = arith.constant 0 : index
    %39 = vector.load %arg3[%c80, %c0_19] : memref<120x128xf32, #tpu.memory_space<vmem>>, vector<1x8xf32>
    %40 = vector.broadcast %39 : vector<1x8xf32> to vector<128x8xf32>
    %41 = arith.mulf %38, %40 : vector<128x8xf32>
    %c88 = arith.constant 88 : index
    %c0_20 = arith.constant 0 : index
    %42 = vector.load %arg3[%c88, %c0_20] : memref<120x128xf32, #tpu.memory_space<vmem>>, vector<1x8xf32>
    %43 = vector.broadcast %42 : vector<1x8xf32> to vector<128x8xf32>
    %44 = arith.addf %41, %43 : vector<128x8xf32>
    %cst_21 = arith.constant 0.000000e+00 : f32
    %45 = vector.broadcast %cst_21 : f32 to vector<128x8xf32>
    %46 = arith.maximumf %44, %45 : vector<128x8xf32>
    %47 = vector.shape_cast %46 : vector<128x8xf32> to vector<16x8x8xf32>
    %48 = vector.broadcast %7 : vector<16x8x1xf32> to vector<16x8x8xf32>
    %49 = arith.mulf %48, %47 : vector<16x8x8xf32>
    "tpu.trace_start"() <{level = 10 : i32, message = "gij,gjf->gif"}> : () -> ()
    %cst_22 = arith.constant dense<0.000000e+00> : vector<16x8x8xf32>
    %50 = tpu.matmul %1, %49, %cst_22 {dimension_numbers = #tpu.dot_dimension_numbers<[2], [1], [1], [2], [0, 0, 0, 1, 1, 2], [0], [0]>} : vector<16x8x8xf32>, vector<16x8x8xf32>, vector<16x8x8xf32> -> vector<16x8x8xf32>
    "tpu.trace_stop"() : () -> ()
    %51 = vector.broadcast %7 : vector<16x8x1xf32> to vector<16x8x8xf32>
    %52 = arith.mulf %51, %50 : vector<16x8x8xf32>
    %53 = vector.broadcast %7 : vector<16x8x1xf32> to vector<16x8x8xf32>
    %54 = arith.mulf %53, %52 : vector<16x8x8xf32>
    "tpu.trace_start"() <{level = 10 : i32, message = "gij,gjf->gif"}> : () -> ()
    %cst_23 = arith.constant dense<0.000000e+00> : vector<16x8x8xf32>
    %55 = tpu.matmul %1, %54, %cst_23 {dimension_numbers = #tpu.dot_dimension_numbers<[2], [1], [1], [2], [0, 0, 0, 1, 1, 2], [0], [0]>} : vector<16x8x8xf32>, vector<16x8x8xf32>, vector<16x8x8xf32> -> vector<16x8x8xf32>
    "tpu.trace_stop"() : () -> ()
    %56 = vector.broadcast %7 : vector<16x8x1xf32> to vector<16x8x8xf32>
    %57 = arith.mulf %56, %55 : vector<16x8x8xf32>
    %c40 = arith.constant 40 : index
    %c0_24 = arith.constant 0 : index
    %58 = vector.load %arg3[%c40, %c0_24] : memref<120x128xf32, #tpu.memory_space<vmem>>, vector<8x8xf32>
    %cst_25 = arith.constant dense<0.000000e+00> : vector<128x8xf32>
    %59 = tpu.matmul %46, %58, %cst_25 {dimension_numbers = #tpu.dot_dimension_numbers<[1], [0], [0], [1], [0, 0, 1, 1], [], []>} : vector<128x8xf32>, vector<8x8xf32>, vector<128x8xf32> -> vector<128x8xf32>
    %60 = vector.shape_cast %52 : vector<16x8x8xf32> to vector<128x8xf32>
    %c48 = arith.constant 48 : index
    %c0_26 = arith.constant 0 : index
    %61 = vector.load %arg3[%c48, %c0_26] : memref<120x128xf32, #tpu.memory_space<vmem>>, vector<8x8xf32>
    %cst_27 = arith.constant dense<0.000000e+00> : vector<128x8xf32>
    %62 = tpu.matmul %60, %61, %cst_27 {dimension_numbers = #tpu.dot_dimension_numbers<[1], [0], [0], [1], [0, 0, 1, 1], [], []>} : vector<128x8xf32>, vector<8x8xf32>, vector<128x8xf32> -> vector<128x8xf32>
    %63 = arith.addf %59, %62 : vector<128x8xf32>
    %64 = vector.shape_cast %57 : vector<16x8x8xf32> to vector<128x8xf32>
    %c56 = arith.constant 56 : index
    %c0_28 = arith.constant 0 : index
    %65 = vector.load %arg3[%c56, %c0_28] : memref<120x128xf32, #tpu.memory_space<vmem>>, vector<8x8xf32>
    %cst_29 = arith.constant dense<0.000000e+00> : vector<128x8xf32>
    %66 = tpu.matmul %64, %65, %cst_29 {dimension_numbers = #tpu.dot_dimension_numbers<[1], [0], [0], [1], [0, 0, 1, 1], [], []>} : vector<128x8xf32>, vector<8x8xf32>, vector<128x8xf32> -> vector<128x8xf32>
    %67 = arith.addf %63, %66 : vector<128x8xf32>
    %c96 = arith.constant 96 : index
    %c0_30 = arith.constant 0 : index
    %68 = vector.load %arg3[%c96, %c0_30] : memref<120x128xf32, #tpu.memory_space<vmem>>, vector<1x8xf32>
    %69 = vector.broadcast %68 : vector<1x8xf32> to vector<128x8xf32>
    %70 = arith.mulf %67, %69 : vector<128x8xf32>
    %c104 = arith.constant 104 : index
    %c0_31 = arith.constant 0 : index
    %71 = vector.load %arg3[%c104, %c0_31] : memref<120x128xf32, #tpu.memory_space<vmem>>, vector<1x8xf32>
    %72 = vector.broadcast %71 : vector<1x8xf32> to vector<128x8xf32>
    %73 = arith.addf %70, %72 : vector<128x8xf32>
    %cst_32 = arith.constant 0.000000e+00 : f32
    %74 = vector.broadcast %cst_32 : f32 to vector<128x8xf32>
    %75 = arith.maximumf %73, %74 : vector<128x8xf32>
    %76 = vector.shape_cast %75 : vector<128x8xf32> to vector<16x8x8xf32>
    %77 = tpu.iota {dimensions = array<i32: 1>} : vector<16x8x1xi32>
    %c8_i32 = arith.constant 8 : i32
    %78 = vector.broadcast %c8_i32 : i32 to vector<16x8x1xi32>
    %79 = arith.cmpi slt, %77, %78 : vector<16x8x1xi32>
    %80 = arith.extui %79 : vector<16x8x1xi1> to vector<16x8x1xi32>
    %81 = arith.sitofp %80 : vector<16x8x1xi32> to vector<16x8x1xf32>
    %82 = vector.broadcast %81 : vector<16x8x1xf32> to vector<16x8x8xf32>
    %83 = arith.mulf %76, %82 : vector<16x8x8xf32>
    %cst_33 = arith.constant dense<0.000000e+00> : vector<16x8xf32>
    %84 = vector.multi_reduction <add>, %83, %cst_33 [1] : vector<16x8x8xf32> to vector<16x8xf32>
    %cst_34 = arith.constant 1.250000e-01 : f32
    %85 = vector.broadcast %cst_34 : f32 to vector<16x8xf32>
    %86 = arith.mulf %84, %85 : vector<16x8xf32>
    %c64 = arith.constant 64 : index
    %c0_35 = arith.constant 0 : index
    %87 = vector.load %arg3[%c64, %c0_35] : memref<120x128xf32, #tpu.memory_space<vmem>>, vector<8x128xf32>
    %cst_36 = arith.constant dense<0.000000e+00> : vector<16x128xf32>
    %88 = tpu.matmul %86, %87, %cst_36 {dimension_numbers = #tpu.dot_dimension_numbers<[1], [0], [0], [1], [0, 0, 1, 1], [], []>} : vector<16x8xf32>, vector<8x128xf32>, vector<16x128xf32> -> vector<16x128xf32>
    %c112 = arith.constant 112 : index
    %c0_37 = arith.constant 0 : index
    %89 = vector.load %arg3[%c112, %c0_37] : memref<120x128xf32, #tpu.memory_space<vmem>>, vector<1x128xf32>
    %90 = vector.broadcast %89 : vector<1x128xf32> to vector<16x128xf32>
    %91 = arith.addf %88, %90 : vector<16x128xf32>
    %c0_38 = arith.constant 0 : index
    %c0_39 = arith.constant 0 : index
    %92 = vector.load %arg4[%c0_38, %c0_39] : memref<16x128xf32, #tpu.memory_space<vmem>>, vector<16x128xf32>
    tpu.vector_store %arg4[%c0_38, %c0_39], %91 {strides = array<i32>} : memref<16x128xf32, #tpu.memory_space<vmem>>, vector<16x128xf32>,
    return
  }
  func.func @transform_0(%arg0: i32) -> (i32, i32, i32) {
    %c0_i32 = arith.constant 0 : i32
    %c0_i32_0 = arith.constant 0 : i32
    %c0_i32_1 = arith.constant 0 : i32
    return %arg0, %c0_i32, %c0_i32_0 : i32, i32, i32
  }
  func.func @transform_1(%arg0: i32) -> (i32, i32, i32) {
    %c0_i32 = arith.constant 0 : i32
    %c0_i32_0 = arith.constant 0 : i32
    %c0_i32_1 = arith.constant 0 : i32
    return %arg0, %c0_i32, %c0_i32_0 : i32, i32, i32
  }
  func.func @transform_2(%arg0: i32) -> (i32, i32) {
    %c0_i32 = arith.constant 0 : i32
    %c0_i32_0 = arith.constant 0 : i32
    %c0_i32_1 = arith.constant 0 : i32
    return %c0_i32, %c0_i32_0 : i32, i32
  }
  func.func @transform_3(%arg0: i32) -> (i32, i32) {
    %c0_i32 = arith.constant 0 : i32
    %c0_i32_0 = arith.constant 0 : i32
    return %arg0, %c0_i32 : i32, i32
  }
}

</mosaic_0001>

<bundles_post_ra>
// kernel: tpu_custom_call.1
= control target key start
LH: loop header
LB: loop body
LE: loop exit
PB: predicated region body
PF: predicated region fallthrough
CT: control target
= control target key end

     0   :  { %8 = vsyncpa [#allocation3], 0  ;;  %s9539_s0 = inlined_call_operand.vmem [shape: f32[48,8,16], index: 0, kind: input, shape index: {}]   ;;  %s9540_s1 = inlined_call_operand.vmem [shape: f32[48,8,8], index: 1, kind: input, shape index: {}]   ;;  %s9541_s2 = inlined_call_operand.vmem [shape: f32[120,128], index: 2, kind: input, shape index: {}]   ;;  %s9542_s3 = inlined_call_operand.hbm [shape: f32[48,128], index: 3, kind: output, shape index: {}]  }
   0x1   :  { %10 = vsyncpa [#allocation3 + $0x1], 0  ;;  %s8222_s12 = smov 0   ;;  %s8224_s13 = smov 0  }
   0x2   :  { %s8226_s14 = smov 0   ;;  %s8228_s15 = smov 0  }
   0x3 LB: > { %s8243_s16 = sadd.s32 4294967295, %s8195_s15   ;;  %s6933_s17 = sadd.s32 4294967294, %s8195_s15   ;;  %s8195_s15 = sphi %s8228_s15, %s9568_s15   ;;  %s8191_s14 = sphi %s8226_s14, %s9567_s14   ;;  %s8187_s13 = sphi %s8224_s13, %s9566_s13   ;;  %s8183_s12 = sphi %s8222_s12, %s9565_s12  }
   0x4   : > { %s8247_s18 = sadd.s32 1, %s8195_s15   ;;  %s96_s19 = sadd.s32 1, %s8191_s14 }
   0x5   : > { %s93_s20 = ssub.s32 %s8195_s15, %s8247_s18  ;;  %p106_p0 = scmp.ne.s32.totalorder %s8191_s14, %s8187_s13 }
   0x6   : > { %p94_p1 = scmp.eq.s32.totalorder %s93_s20, 0  ;;  %p107_p2 = scmp.eq.s32.totalorder %s8243_s16, 2 }
   0x7   : > { %p112_p3 = scmp.ne.s32.totalorder %s8187_s13, %s8183_s12  ;;  %p113_p4 = scmp.eq.s32.totalorder %s6933_s17, 2 }
   0x8   : > { %s8258_s21 = scalar_select %p94_p1, %s8191_s14, %s96_s19  }
   0x9   : > { %p8260_p5 = por %p107_p2, %p106_p0  ;;  %p8264_p6 = por %p113_p4, %p112_p3 }
   0xa   : > { %p6936_p7 = scmp.ge.s32.totalorder %s8195_s15, 1  ;;  %p152_p8 = scmp.lt.s32.totalorder %s8195_s15, 4 }
   0xc   : > { %p153_p9 = pnand %p6936_p7, %p152_p8 }
   0xd   : > { %v307_v0 = vld [vmem:[%s9541_s2] sm:$0xff] (!%p153_p9)  ;;  %v308_v1 = vld [vmem:[%s9541_s2 + $0x8] sm:$0xff] (!%p153_p9)  ;;  %s6938_s28 = sshll.u32 (!%p153_p9), %s8243_s16, 4  ;;  %vm314_vm0 = vcmask (!%p153_p9), 130048   ;;  %vm226_vm1 = vcmask (!%p153_p9), 64512   ;;  %v8197_v51 = vmov (!%p153_p9), 0.0  }
   0xe   : > { %156 = sbr.rel (%p153_p9) target bundleno = 1886 (0x75e), region = 32  ;;  %v7908_v2 = vpack.c.bf16 (!%p153_p9), %v308_v1, %v307_v0  ;;  %p182_p10 = scmp.lt.s32.totalorder (!%p153_p9), %s6938_s28, 47  ;;  %7427 = vmatprep.subr.mxu1 (!%p153_p9), %v8197_v51  ;;  %vm8198_vm2 = vmmov (!%p153_p9), 0   ;;  %v8408_v55 = vld [vmem:[%s9541_s2 + $0x48] ss:$0 sm:$0xff] (!%p153_p9)  ;;  %vm6743_vm3 = vcmask (!%p153_p9), 1041409  }
   0xf   : > { %7429 = vmatprep.mubr.msk.f32.mxu1 (!%p153_p9), %vm8198_vm2, %v8197_v51  ;;  %vm6745_vm4 = vcmask (!%p153_p9), 1042434   ;;  %vm6747_vm5 = vcmask (!%p153_p9), 1043459   ;;  %vm6749_vm6 = vcmask (!%p153_p9), 1044484   ;;  %vm6751_vm7 = vcmask (!%p153_p9), 1045509   ;;  %s178_s24 = sand.u32 (!%p153_p9), 1, %s8187_s13   ;;  %s7147_s30 = sshll.u32 (!%p153_p9), %s8243_s16, 8 }
  0x10   : > { %7909 = vmatprep.subr.bf16.mxu0 (!%p153_p9), %v7908_v2  ;;  %vm6753_vm8 = vcmask (!%p153_p9), 1046534   ;;  %vm6755_vm9 = vcmask (!%p153_p9), 1047559   ;;  %s6937_s25 = sshll.u32 (!%p153_p9), %s178_s24, 4  ;;  %s9496_s6 = scalar_lea.hbm (!%p153_p9), %s9542_s3, %s7147_s30 }
  0x11   : > { %7911 = vmatpush3.bf16.msra.mxu0 (!%p153_p9), %v7908_v2  ;;  %s9498_s7 = scalar_lea.sflag (!%p153_p9), [#allocation3], %s178_s24  ;;  %s8199_s16 = smov (!%p153_p9), [#allocation2]  }
  0x12   : > { %7472 = vmatprep.subr.mxu0 (!%p153_p9), %v8197_v51  ;;  %s8137_s9 = sshll.u32 (!%p153_p9), %s8199_s16, 4  ;;  %s8138_s9 = int_to_ptr.vmem [resolvable:$false] %s8137_s9 }
  0x13   : > { %s8139_s10 = scalar_lea.vmem (!%p153_p9), %s8138_s9, 512 }
  0x15   : > { %s9570_s28 = smov (!%p182_p10, %s6938_s28), 47 }
  0x16   : > { %s6939_s29 = sshll.u32 %s9570_s28, 3  ;;  %s180_s28 = scalar_lea.vmem [#allocation2], %s6937_s25 }
  0x17   : > { %s8280_s5 = scalar_lea.vmem %s9539_s0, %s6939_s29  ;;  %s8289_s8 = scalar_lea.vmem %s9540_s1, %s6939_s29 }
  0x18   : > { %v194_v3 = vld [vmem:[%s8280_s5] sm:$0xff]  ;;  %v195_v4 = vld [vmem:[%s8280_s5 + $0x8] sm:$0xff]  ;;  %v196_v5 = vld [vmem:[%s8280_s5 + $0x10] sm:$0xff]  ;;  %s6859_s29 = sshll.u32 %s180_s28, 4  ;;  %s9491_s29 = int_to_ptr.vmem [resolvable:$true] %s6859_s29 }
  0x19   : > { %7403 = vmatprep.mubr.msk.f32.mxu0 %vm314_vm0, %v194_v3  ;;  %v197_v6 = vld [vmem:[%s8280_s5 + $0x18] sm:$0xff]  ;;  %v198_v7 = vld [vmem:[%s8280_s5 + $0x20] sm:$0xff]  ;;  %v8299_v9 = vld [vmem:[%s8289_s8 + $0x10] sm:$0xff]  ;;  %p8140_p0 = scmp.lt.s32.totalorder %s9491_s29, %s8138_s9 }
  0x1a   : > { %7404 = vmatmul.mubr.msk.f32.vlgmr.msra.gmra.mrb[0].mxu0 %vm314_vm0, %v195_v4  ;;  %v8296_v8 = vld [vmem:[%s8289_s8] sm:$0xff]  ;;  %v233_v11 = vsel %vm226_vm1, %v8299_v9, 0.0  ;;  %v8307_v12 = vld [vmem:[%s8289_s8 + $0x8] sm:$0xff]  ;;  %v8310_v13 = vld [vmem:[%s8289_s8 + $0x18] sm:$0xff] }
  0x1b   : > { %7406 = vmatprep.mubr.msk.f32.mxu0 %vm314_vm0, %v196_v5  ;;  %v227_v10 = vsel %vm226_vm1, %v8296_v8, 0.0  ;;  %v199_v14 = vld [vmem:[%s8280_s5 + $0x28] sm:$0xff]  ;;  %v200_v15 = vld [vmem:[%s8280_s5 + $0x30] sm:$0xff]  ;;  %234 = vadd.xlane.f32.xlu1 %v233_v11  ;;  %v230_v16 = vsel %vm226_vm1, %v8307_v12, 0.0  ;;  %v236_v17 = vsel %vm226_vm1, %v8310_v13, 0.0  ;;  %v8320_v18 = vld [vmem:[%s8289_s8 + $0x20] sm:$0xff] }
  0x1c   : > { %228 = vadd.xlane.f32.xlu0 %v227_v10  ;;  %v8324_v19 = vld [vmem:[%s8289_s8 + $0x28] sm:$0xff]  ;;  %v201_v20 = vld [vmem:[%s8280_s5 + $0x38] sm:$0xff]  ;;  %v202_v21 = vld [vmem:[%s8280_s5 + $0x40] sm:$0xff]  ;;  %v239_v22 = vsel %vm226_vm1, %v8320_v18, 0.0 }
  0x1d   : > { %v242_v23 = vsel %vm226_vm1, %v8324_v19, 0.0  ;;  %v8334_v24 = vld [vmem:[%s8289_s8 + $0x30] sm:$0xff]  ;;  %v8338_v25 = vld [vmem:[%s8289_s8 + $0x38] sm:$0xff]  ;;  %v203_v26 = vld [vmem:[%s8280_s5 + $0x48] sm:$0xff] }
  0x1e   : > { %7407 = vmatmul.mubr.msk.f32.gmra.mrb[2].mxu0 %vm314_vm0, %v197_v6  ;;  %v204_v27 = vld [vmem:[%s8280_s5 + $0x50] sm:$0xff]  ;;  %v245_v28 = vsel %vm226_vm1, %v8334_v24, 0.0  ;;  %v248_v29 = vsel %vm226_vm1, %v8338_v25, 0.0  ;;  %v8348_v30 = vld [vmem:[%s8289_s8 + $0x40] sm:$0xff]  ;;  %v8352_v31 = vld [vmem:[%s8289_s8 + $0x48] sm:$0xff] }
  0x1f   : > { %7409 = vmatprep.mubr.msk.f32.mxu0 %vm314_vm0, %v198_v7  ;;  %237 = vadd.xlane.f32.xlu1 %v236_v17  ;;  %v205_v32 = vld [vmem:[%s8280_s5 + $0x58] sm:$0xff]  ;;  %v206_v33 = vld [vmem:[%s8280_s5 + $0x60] sm:$0xff]  ;;  %v251_v34 = vsel %vm226_vm1, %v8348_v30, 0.0  ;;  %v254_v35 = vsel %vm226_vm1, %v8352_v31, 0.0  ;;  %v8362_v36 = vld [vmem:[%s8289_s8 + $0x50] sm:$0xff] }
  0x20   : > { %231 = vadd.xlane.f32.xlu0 %v230_v16  ;;  %v8366_v37 = vld [vmem:[%s8289_s8 + $0x58] sm:$0xff]  ;;  %v207_v38 = vld [vmem:[%s8280_s5 + $0x68] sm:$0xff]  ;;  %v208_v39 = vld [vmem:[%s8280_s5 + $0x70] sm:$0xff]  ;;  %v257_v40 = vsel %vm226_vm1, %v8362_v36, 0.0 }
  0x21   : > { %v260_v41 = vsel %vm226_vm1, %v8366_v37, 0.0  ;;  %v8376_v42 = vld [vmem:[%s8289_s8 + $0x60] sm:$0xff]  ;;  %v8380_v43 = vld [vmem:[%s8289_s8 + $0x68] sm:$0xff]  ;;  %v209_v44 = vld [vmem:[%s8280_s5 + $0x78] sm:$0xff] }
  0x22   : > { %7410 = vmatmul.mubr.msk.f32.gmra.mrb[4].mxu0 %vm314_vm0, %v199_v14  ;;  %v263_v45 = vsel %vm226_vm1, %v8376_v42, 0.0  ;;  %v266_v46 = vsel %vm226_vm1, %v8380_v43, 0.0  ;;  %v8389_v47 = vld [vmem:[%s8289_s8 + $0x70] sm:$0xff]  ;;  %v8393_v48 = vld [vmem:[%s8289_s8 + $0x78] sm:$0xff] }
  0x23   : > { %7412 = vmatprep.mubr.msk.f32.mxu0 %vm314_vm0, %v200_v15  ;;  %243 = vadd.xlane.f32.xlu1 %v242_v23  ;;  %v269_v49 = vsel %vm226_vm1, %v8389_v47, 0.0  ;;  %v272_v50 = vsel %vm226_vm1, %v8393_v48, 0.0 }
  0x24   : > { %240 = vadd.xlane.f32.xlu0 %v239_v22 }
  0x26   : > { %7413 = vmatmul.mubr.msk.f32.gmra.mrb[6].mxu0 %vm314_vm0, %v201_v20 }
  0x27   : > { %7415 = vmatprep.mubr.msk.f32.mxu0 %vm314_vm0, %v202_v21  ;;  %249 = vadd.xlane.f32.xlu1 %v248_v29 }
  0x28   : > { %246 = vadd.xlane.f32.xlu0 %v245_v28 }
  0x2a   : > { %7416 = vmatmul.mubr.msk.f32.gmra.mrb[8].mxu0 %vm314_vm0, %v203_v26 }
  0x2b   : > { %7418 = vmatprep.mubr.msk.f32.mxu0 %vm314_vm0, %v204_v27  ;;  %255 = vadd.xlane.f32.xlu1 %v254_v35 }
  0x2c   : > { %252 = vadd.xlane.f32.xlu0 %v251_v34 }
  0x2e   : > { %7419 = vmatmul.mubr.msk.f32.gmra.mrb[10].mxu0 %vm314_vm0, %v205_v32 }
  0x2f   : > { %7421 = vmatprep.mubr.msk.f32.mxu0 %vm314_vm0, %v206_v33  ;;  %261 = vadd.xlane.f32.xlu1 %v260_v41 }
  0x30   : > { %258 = vadd.xlane.f32.xlu0 %v257_v40 }
  0x32   : > { %7422 = vmatmul.mubr.msk.f32.gmra.mrb[12].mxu0 %vm314_vm0, %v207_v38 }
  0x33   : > { %7424 = vmatprep.mubr.msk.f32.mxu0 %vm314_vm0, %v208_v39  ;;  %267 = vadd.xlane.f32.xlu1 %v266_v46 }
  0x34   : > { %264 = vadd.xlane.f32.xlu0 %v263_v45 }
  0x36   : > { %7425 = vmatmul.mubr.msk.f32.gmra.mrb[14].mxu0 %vm314_vm0, %v209_v44 }
  0x37   : > { %273 = vadd.xlane.f32.xlu1 %v272_v50  ;;  %7474 = vmatprep.mubr.msk.f32.mxu0 %vm8198_vm2, %v8197_v51 }
  0x38   : > { %270 = vadd.xlane.f32.xlu0 %v269_v49 }
  0xa8   : > { %v235_v52 = vpop.xlane.xlu1 %234 }
  0xa9   : > { %v229_v53 = vpop.xlane.xlu0 %228  ;;  %v277_v2 = vmax.f32 %v235_v52, 1.0 }
  0xaa   : > { %v275_v62 = vmax.f32 %v229_v53, 1.0 }
  0xac   : > { %v238_v54 = vpop.xlane.xlu1 %237 }
  0xad   : > { %v232_v60 = vpop.xlane.xlu0 %231  ;;  %v278_v15 = vmax.f32 %v238_v54, 1.0 }
  0xae   : > { %v276_v10 = vmax.f32 %v232_v60, 1.0 }
  0xb0   : > { %v244_v63 = vpop.xlane.xlu1 %243 }
  0xb1   : > { %v241_v6 = vpop.xlane.xlu0 %240  ;;  %v280_v26 = vmax.f32 %v244_v63, 1.0 }
  0xb2   : > { %v279_v21 = vmax.f32 %v241_v6, 1.0 }
  0xb4   : > { %v8415_v20 = vpop.xlane.xlu1 %249 }
  0xb5   : > { %v247_v23 = vpop.xlane.xlu0 %246 }
  0xb6   : > { %v281_v33 = vmax.f32 %v247_v23, 1.0 }
  0xb8   : > { %v256_v38 = vpop.xlane.xlu1 %255 }
  0xb9   : > { %v284_v54 = vmax.f32 %v256_v38, 1.0 }
  0xed   : > { %v7405_v56 = vpop.f32.mrb[0].mxu0 }
  0xee   : > { %v435_v57 = vadd.f32 %v7405_v56, %v8408_v55  ;;  %v429_v58 = vpop.f32.mrb[1].mxu0 }
  0xef   : > { %v430_v59 = vadd.f32 %v8408_v55, %v429_v58 }
  0xf0   : > { %v6960_v61 = vmul.f32 -1.442695, %v435_v57 }
  0xf1   : > { %v6959_v0 = vmul.f32 -1.442695, %v430_v59  ;;  %v7408_v1 = vpop.f32.mrb[2].mxu0 }
  0xf2   : > { %8021 = vpow2.f32 %v6960_v61  ;;  %v445_v3 = vadd.f32 %v7408_v1, %v8408_v55  ;;  %v439_v4 = vpop.f32.mrb[3].mxu0 }
  0xf3   : > { %8023 = vpow2.f32 %v6959_v0  ;;  %v440_v5 = vadd.f32 %v8408_v55, %v439_v4 }
  0xf4   : > { %v6962_v7 = vmul.f32 -1.442695, %v445_v3  ;;  %8025 = vrsqrt.f32 %v275_v62 }
  0xf5   : > { %v6961_v11 = vmul.f32 -1.442695, %v440_v5  ;;  %v7411_v14 = vpop.f32.mrb[4].mxu0  ;;  %8027 = vrsqrt.f32 %v277_v2 }
  0xf6   : > { %8029 = vpow2.f32 %v6962_v7  ;;  %v455_v16 = vadd.f32 %v7411_v14, %v8408_v55  ;;  %v449_v17 = vpop.f32.mrb[5].mxu0 }
  0xf7   : > { %8031 = vpow2.f32 %v6961_v11  ;;  %v450_v22 = vadd.f32 %v8408_v55, %v449_v17 }
  0xf8   : > { %8033 = vrsqrt.f32 %v276_v10  ;;  %v6964_v27 = vmul.f32 -1.442695, %v455_v16  ;;  %v262_v10 = vpop.xlane.xlu1 %261 }
  0xf9   : > { %v6963_v28 = vmul.f32 -1.442695, %v450_v22  ;;  %v7414_v29 = vpop.f32.mrb[6].mxu0  ;;  %8035 = vrsqrt.f32 %v278_v15  ;;  %v286_v23 = vmax.f32 %v262_v10, 1.0 }
  0xfa   : > { %v459_v32 = vpop.f32.mrb[7].mxu0  ;;  %8037 = vrsqrt.f32 %v279_v21  ;;  %v465_v41 = vadd.f32 %v7414_v29, %v8408_v55 }
  0xfb   : > { %8039 = vpow2.f32 %v6963_v28  ;;  %v460_v34 = vadd.f32 %v8408_v55, %v459_v32 }
  0xfc   : > { %v8022_v35 = vpop.eup %8021  ;;  %8041 = vrsqrt.f32 %v280_v26  ;;  %v6966_v60 = vmul.f32 -1.442695, %v465_v41 }
  0xfd   : > { %v8024_v39 = vpop.eup %8023  ;;  %v557_v40 = vadd.f32 1.0, %v8022_v35  ;;  %8043 = vpow2.f32 %v6964_v27  ;;  %v6965_v44 = vmul.f32 -1.442695, %v460_v34  ;;  %v7417_v45 = vpop.f32.mrb[8].mxu0 }
  0xfe   : > { %v8420_v46 = vpop.eup %8025  ;;  %v556_v49 = vadd.f32 1.0, %v8024_v39  ;;  %v475_v50 = vadd.f32 %v7417_v45, %v8408_v55  ;;  %v469_v52 = vpop.f32.mrb[9].mxu0  ;;  %8045 = vrsqrt.f32 %v281_v33 }
  0xff   : > { %v8423_v53 = vpop.eup %8027  ;;  %8047 = vrcp.f32 %v557_v40  ;;  %v470_v58 = vadd.f32 %v8408_v55, %v469_v52 }
 0x100   : > { %v8030_v56 = vpop.eup %8029  ;;  %8049 = vrcp.f32 %v556_v49  ;;  %v6968_v57 = vmul.f32 -1.442695, %v475_v50  ;;  %v253_v49 = vpop.xlane.xlu0 %252 }
 0x101   : > { %v8032_v59 = vpop.eup %8031  ;;  %8051 = vpow2.f32 %v6965_v44  ;;  %v7420_v61 = vpop.f32.mrb[10].mxu0  ;;  %v559_v3 = vadd.f32 1.0, %v8030_v56  ;;  %v6967_v5 = vmul.f32 -1.442695, %v470_v58 }
 0x102   : > { %v8426_v62 = vpop.eup %8033  ;;  %v558_v63 = vadd.f32 1.0, %v8032_v59  ;;  %8053 = vpow2.f32 %v6968_v57  ;;  %v485_v0 = vadd.f32 %v7420_v61, %v8408_v55  ;;  %v479_v1 = vpop.f32.mrb[11].mxu0 }
 0x103   : > { %v8429_v2 = vpop.eup %8035  ;;  %8055 = vrsqrt.f32 %v284_v54  ;;  %v480_v7 = vadd.f32 %v8408_v55, %v479_v1  ;;  %v268_v57 = vpop.xlane.xlu1 %267 }
 0x104   : > { %v8431_v4 = vpop.eup %8037  ;;  %8057 = vrcp.f32 %v558_v63  ;;  %v6970_v6 = vmul.f32 -1.442695, %v485_v0  ;;  %v259_v10 = vpop.xlane.xlu0 %258 }
 0x105   : > { %v8040_v11 = vpop.eup %8039  ;;  %8059 = vpow2.f32 %v6966_v60  ;;  %v7423_v14 = vpop.f32.mrb[12].mxu0  ;;  %v6969_v27 = vmul.f32 -1.442695, %v480_v7  ;;  %v282_v7 = vmax.f32 %v8415_v20, 1.0 }
 0x106   : > { %v8434_v15 = vpop.eup %8041  ;;  %v560_v16 = vadd.f32 1.0, %v8040_v11  ;;  %8061 = vpow2.f32 %v6970_v6  ;;  %v495_v17 = vadd.f32 %v7423_v14, %v8408_v55  ;;  %v489_v21 = vpop.f32.mrb[13].mxu0 }
 0x107   : > { %v8044_v22 = vpop.eup %8043  ;;  %8063 = vrcp.f32 %v559_v3  ;;  %v490_v32 = vadd.f32 %v8408_v55, %v489_v21 }
 0x108   : > { %v8437_v26 = vpop.eup %8045  ;;  %8065 = vpow2.f32 %v6967_v5  ;;  %v6972_v28 = vmul.f32 -1.442695, %v495_v17  ;;  %v561_v35 = vadd.f32 1.0, %v8044_v22  ;;  %v274_v17 = vpop.xlane.xlu1 %273  ;;  %v283_v22 = vmax.f32 %v253_v49, 1.0 }
 0x109   : > { %v8439_v29 = vpop.eup %8047  ;;  %8067 = vrcp.f32 %v560_v16  ;;  %v7426_v33 = vpop.f32.mrb[14].mxu0  ;;  %v6971_v54 = vmul.f32 -1.442695, %v490_v32  ;;  %v290_v32 = vmax.f32 %v274_v17, 1.0 }
 0x10a   : > { %v8442_v34 = vpop.eup %8049  ;;  %8069 = vpow2.f32 %v6972_v28  ;;  %v505_v38 = vadd.f32 %v7426_v33, %v8408_v55  ;;  %v499_v39 = vpop.f32.mrb[15].mxu0  ;;  %v605_v56 = vmul.f32 %v8439_v29, %v8426_v62 }
 0x10b   : > { %v8052_v40 = vpop.eup %8051  ;;  %v604_v41 = vmul.f32 %v8442_v34, %v8420_v46  ;;  %8071 = vrsqrt.f32 %v286_v23  ;;  %v500_v58 = vadd.f32 %v8408_v55, %v499_v39  ;;  %v288_v55 = vmax.f32 %v268_v57, 1.0  ;;  %v265_v39 = vpop.xlane.xlu0 %264 }
 0x10c   : > { %v8054_v44 = vpop.eup %8053  ;;  %8073 = vpow2.f32 %v6969_v27  ;;  %v6974_v45 = vmul.f32 -1.442695, %v505_v38  ;;  %v562_v60 = vadd.f32 1.0, %v8052_v40  ;;  %v285_v38 = vmax.f32 %v259_v10, 1.0 }
 0x10d   : > { %v8447_v50 = vpop.eup %8055  ;;  %v565_v52 = vadd.f32 1.0, %v8054_v44  ;;  %7428 = vmatpush3.msra.mxu1 %v604_v41  ;;  %8075 = vrcp.f32 %v561_v35  ;;  %v6973_v5 = vmul.f32 -1.442695, %v500_v58  ;;  %v287_v58 = vmax.f32 %v265_v39, 1.0 }
 0x10e   : > { %v8452_v59 = vpop.eup %8057  ;;  %7430 = vmatmul.mubr.msk.f32.vlgmr.msra.gmra.mrb[0].mxu1 %vm226_vm1, %v8296_v8  ;;  %7432 = vmatprep.subr.mxu1 %v8197_v51 }
 0x10f   : > { %v8060_v61 = vpop.eup %8059  ;;  %8077 = vrcp.f32 %v565_v52  ;;  %7433 = vmatpush3.msra.mxu1 %v605_v56  ;;  %7434 = vmatprep.mubr.msk.f32.mxu1 %vm8198_vm2, %v8197_v51  ;;  %v606_v63 = vmul.f32 %v8452_v59, %v8423_v53 }
 0x110   : > { %v8062_v0 = vpop.eup %8061  ;;  %8079 = vpow2.f32 %v6974_v45  ;;  %7437 = vmatprep.subr.mxu1 %v8197_v51  ;;  %v563_v16 = vadd.f32 1.0, %v8060_v61 }
 0x111   : > { %v8462_v1 = vpop.eup %8063  ;;  %v567_v3 = vadd.f32 1.0, %v8062_v0  ;;  %8081 = vpow2.f32 %v6971_v54  ;;  %v271_v0 = vpop.xlane.xlu0 %270 }
 0x112   : > { %v8066_v6 = vpop.eup %8065  ;;  %8083 = vrcp.f32 %v562_v60  ;;  %7435 = vmatmul.mubr.msk.f32.vlgmr.msra.gmra.mrb[2].mxu1 %vm226_vm1, %v8307_v12  ;;  %v607_v23 = vmul.f32 %v8462_v1, %v8429_v2 }
 0x113   : > { %v8467_v11 = vpop.eup %8067  ;;  %8085 = vrcp.f32 %v567_v3  ;;  %7438 = vmatpush3.msra.mxu1 %v606_v63  ;;  %7439 = vmatprep.mubr.msk.f32.mxu1 %vm8198_vm2, %v8197_v51  ;;  %v564_v28 = vadd.f32 1.0, %v8066_v6 }
 0x114   : > { %v8070_v14 = vpop.eup %8069  ;;  %8087 = vrsqrt.f32 %v288_v55  ;;  %7442 = vmatprep.subr.mxu1 %v8197_v51  ;;  %v608_v33 = vmul.f32 %v8467_v11, %v8431_v4 }
 0x115   : > { %v8472_v21 = vpop.eup %8071  ;;  %v569_v20 = vadd.f32 1.0, %v8070_v14  ;;  %8089 = vpow2.f32 %v6973_v5 }
 0x116   : > { %v8074_v27 = vpop.eup %8073  ;;  %8091 = vrsqrt.f32 %v282_v7  ;;  %7440 = vmatmul.mubr.msk.f32.vlgmr.msra.gmra.mrb[4].mxu1 %vm226_vm1, %v8299_v9  ;;  %v289_v7 = vmax.f32 %v271_v0, 1.0 }
 0x117   : > { %8093 = vrcp.f32 %v569_v20  ;;  %7443 = vmatpush3.msra.mxu1 %v607_v23  ;;  %7444 = vmatprep.mubr.msk.f32.mxu1 %vm8198_vm2, %v8197_v51  ;;  %v8482_v35 = vpop.eup %8075  ;;  %v566_v44 = vadd.f32 1.0, %v8074_v27 }
 0x118   : > { %8095 = vrcp.f32 %v563_v16  ;;  %7447 = vmatprep.subr.mxu1 %v8197_v51  ;;  %v609_v57 = vmul.f32 %v8482_v35, %v8434_v15 }
 0x119   : > { %v8485_v40 = vpop.eup %8077  ;;  %8097 = vrsqrt.f32 %v283_v22 }
 0x11a   : > { %v8080_v41 = vpop.eup %8079  ;;  %8099 = vrcp.f32 %v564_v28  ;;  %7445 = vmatmul.mubr.msk.f32.vlgmr.msra.gmra.mrb[6].mxu1 %vm226_vm1, %v8310_v13  ;;  %v613_v45 = vmul.f32 %v8485_v40, %v8447_v50 }
 0x11b   : > { %v8082_v49 = vpop.eup %8081  ;;  %v571_v52 = vadd.f32 1.0, %v8080_v41  ;;  %8101 = vrsqrt.f32 %v290_v32  ;;  %7448 = vmatpush3.msra.mxu1 %v608_v33  ;;  %7449 = vmatprep.mubr.msk.f32.mxu1 %vm8198_vm2, %v8197_v51 }
 0x11c   : > { %v8493_v54 = vpop.eup %8083  ;;  %7473 = vmatpush3.msra.mxu0 %v613_v45  ;;  %7452 = vmatprep.subr.mxu1 %v8197_v51  ;;  %8103 = vrsqrt.f32 %v285_v38  ;;  %v568_v61 = vadd.f32 1.0, %v8082_v49 }
 0x11d   : > { %v8496_v56 = vpop.eup %8085  ;;  %8105 = vrcp.f32 %v571_v52  ;;  %7475 = vmatmul.mubr.msk.f32.vlgmr.msra.gmra.mrb[16].mxu0 %vm226_vm1, %v8352_v31  ;;  %7482 = vmatprep.subr.mxu0 %v8197_v51  ;;  %v610_v3 = vmul.f32 %v8493_v54, %v8437_v26 }
 0x11e   : > { %v8503_v60 = vpop.eup %8087  ;;  %8107 = vrcp.f32 %v566_v44  ;;  %7450 = vmatmul.mubr.msk.f32.vlgmr.msra.gmra.mrb[8].mxu1 %vm226_vm1, %v8320_v18  ;;  %v615_v63 = vmul.f32 %v8496_v56, %v8472_v21  ;;  %7484 = vmatprep.mubr.msk.f32.mxu0 %vm8198_vm2, %v8197_v51 }
 0x11f   : > { %v8090_v55 = vpop.eup %8089  ;;  %7453 = vmatpush3.msra.mxu1 %v609_v57  ;;  %7454 = vmatprep.mubr.msk.f32.mxu1 %vm8198_vm2, %v8197_v51  ;;  %8109 = vrsqrt.f32 %v287_v58 }
 0x120   : > { %v8515_v5 = vpop.eup %8091  ;;  %7483 = vmatpush3.msra.mxu0 %v615_v63  ;;  %7457 = vmatprep.subr.mxu1 %v8197_v51  ;;  %8111 = vrcp.f32 %v568_v61  ;;  %v570_v14 = vadd.f32 1.0, %v8090_v55 }
 0x121   : > { %v8518_v6 = vpop.eup %8093  ;;  %7485 = vmatmul.mubr.msk.f32.vlgmr.msra.gmra.mrb[18].mxu0 %vm226_vm1, %v8366_v37  ;;  %7492 = vmatprep.subr.mxu0 %v8197_v51  ;;  %8113 = vrsqrt.f32 %v289_v7 }
 0x122   : > { %v8523_v10 = vpop.eup %8095  ;;  %7455 = vmatmul.mubr.msk.f32.vlgmr.msra.gmra.mrb[10].mxu1 %vm226_vm1, %v8324_v19  ;;  %v617_v16 = vmul.f32 %v8518_v6, %v8503_v60  ;;  %7494 = vmatprep.mubr.msk.f32.mxu0 %vm8198_vm2, %v8197_v51  ;;  %8115 = vrcp.f32 %v570_v14 }
 0x123   : > { %v8531_v17 = vpop.eup %8097  ;;  %7458 = vmatpush3.msra.mxu1 %v610_v3  ;;  %7459 = vmatprep.mubr.msk.f32.mxu1 %vm8198_vm2, %v8197_v51  ;;  %v611_v23 = vmul.f32 %v8523_v10, %v8515_v5 }
 0x124   : > { %v8535_v20 = vpop.eup %8099  ;;  %7493 = vmatpush3.msra.mxu0 %v617_v16  ;;  %7462 = vmatprep.subr.mxu1 %v8197_v51 }
 0x125   : > { %v8538_v22 = vpop.eup %8101  ;;  %7495 = vmatmul.mubr.msk.f32.vlgmr.msra.gmra.mrb[20].mxu0 %vm226_vm1, %v8380_v43  ;;  %7502 = vmatprep.subr.mxu0 %v8197_v51  ;;  %v612_v32 = vmul.f32 %v8535_v20, %v8531_v17 }
 0x126   : > { %v8545_v27 = vpop.eup %8103  ;;  %7460 = vmatmul.mubr.msk.f32.vlgmr.msra.gmra.mrb[12].mxu1 %vm226_vm1, %v8334_v24  ;;  %7504 = vmatprep.mubr.msk.f32.mxu0 %vm8198_vm2, %v8197_v51 }
 0x127   : > { %v8551_v28 = vpop.eup %8105  ;;  %7463 = vmatpush3.msra.mxu1 %v611_v23  ;;  %7464 = vmatprep.mubr.msk.f32.mxu1 %vm8198_vm2, %v8197_v51 }
 0x128   : > { %v8557_v33 = vpop.eup %8107  ;;  %v619_v38 = vmul.f32 %v8551_v28, %v8538_v22  ;;  %7467 = vmatprep.subr.mxu1 %v8197_v51 }
 0x129   : > { %v8564_v39 = vpop.eup %8109  ;;  %v614_v41 = vmul.f32 %v8557_v33, %v8545_v27 }
 0x12a   : > { %7503 = vmatpush3.msra.mxu0 %v619_v38  ;;  %7465 = vmatmul.mubr.msk.f32.vlgmr.msra.gmra.mrb[14].mxu1 %vm226_vm1, %v8338_v25  ;;  %v8570_v44 = vpop.eup %8111 }
 0x12b   : > { %7505 = vmatmul.mubr.msk.f32.vlgmr.msra.gmra.mrb[22].mxu0 %vm226_vm1, %v8393_v48  ;;  %7468 = vmatpush3.msra.mxu1 %v612_v32  ;;  %v8580_v45 = vpop.eup %8113  ;;  %v616_v49 = vmul.f32 %v8570_v44, %v8564_v39 }
 0x12c   : > { %7469 = vmatprep.mubr.msk.f32.mxu1 %vm8198_vm2, %v8197_v51  ;;  %7477 = vmatprep.subr.mxu1 %v8197_v51  ;;  %v8586_v52 = vpop.eup %8115 }
 0x12d   : > { %7512 = vmatprep.subr.mxu0 %v8197_v51  ;;  %7514 = vmatprep.mubr.msk.f32.mxu0 %vm8198_vm2, %v8197_v51  ;;  %v618_v57 = vmul.f32 %v8586_v52, %v8580_v45 }
 0x12e   : > { %7470 = vmatmul.mubr.msk.f32.vlgmr.msra.gmra.mrb[16].mxu1 %vm226_vm1, %v8348_v30 }
 0x12f   : > { %7478 = vmatpush3.msra.mxu1 %v614_v41  ;;  %7479 = vmatprep.mubr.msk.f32.mxu1 %vm8198_vm2, %v8197_v51 }
 0x130   : > { %7487 = vmatprep.subr.mxu1 %v8197_v51 }
 0x132   : > { %7480 = vmatmul.mubr.msk.f32.vlgmr.msra.gmra.mrb[18].mxu1 %vm226_vm1, %v8362_v36 }
 0x133   : > { %7488 = vmatpush3.msra.mxu1 %v616_v49  ;;  %7489 = vmatprep.mubr.msk.f32.mxu1 %vm8198_vm2, %v8197_v51 }
 0x134   : > { %7497 = vmatprep.subr.mxu1 %v8197_v51 }
 0x136   : > { %7490 = vmatmul.mubr.msk.f32.vlgmr.msra.gmra.mrb[20].mxu1 %vm226_vm1, %v8376_v42 }
 0x137   : > { %7498 = vmatpush3.msra.mxu1 %v618_v57  ;;  %7499 = vmatprep.mubr.msk.f32.mxu1 %vm8198_vm2, %v8197_v51 }
 0x138   : > { %7507 = vmatprep.subr.mxu1 %v8197_v51 }
 0x13a   : > { %7500 = vmatmul.mubr.msk.f32.vlgmr.msra.gmra.mrb[22].mxu1 %vm226_vm1, %v8389_v47 }
 0x13b   : > { %7509 = vmatprep.mubr.msk.f32.mxu1 %vm8198_vm2, %v8197_v51 }
 0x1e1   : > { %v689_v58 = vpop.f32.mrb[0].mxu1 }
 0x1e2   : > { %v8606_v61 = vmul.f32 %v8420_v46, %v689_v58  ;;  %v7431_v63 = vpop.f32.mrb[1].mxu1 }
 0x1e4   : > { %v1804_v0 = vmul.f32 %v8420_v46, %v8606_v61 }
 0x1e5   : > { %v762_v55 = vpop.f32.mrb[2].mxu1 }
 0x1e6   : > { %v8611_v3 = vmul.f32 %v8426_v62, %v762_v55  ;;  %v7436_v7 = vpop.f32.mrb[3].mxu1  ;;  %7508 = vmatpush3.msra.mxu1 %v1804_v0 }
 0x1e7   : > { %7510 = vmatmul.mubr.msk.f32.vlgmr.msra.gmra.mrb[24].mxu1 %vm226_vm1, %v8296_v8  ;;  %7517 = vmatprep.subr.mxu1 %v8197_v51 }
 0x1e8   : > { %v1805_v14 = vmul.f32 %v8426_v62, %v8611_v3  ;;  %7519 = vmatprep.mubr.msk.f32.mxu1 %vm8198_vm2, %v8197_v51 }
 0x1e9   : > { %v835_v16 = vpop.f32.mrb[4].mxu1 }
 0x1ea   : > { %v8621_v23 = vmul.f32 %v8423_v53, %v835_v16  ;;  %v7441_v32 = vpop.f32.mrb[5].mxu1  ;;  %7513 = vmatpush3.msra.mxu0 %v1805_v14 }
 0x1eb   : > { %7515 = vmatmul.mubr.msk.f32.vlgmr.msra.gmra.mrb[24].mxu0 %vm226_vm1, %v8307_v12  ;;  %7522 = vmatprep.subr.mxu0 %v8197_v51 }
 0x1ec   : > { %v1806_v8 = vmul.f32 %v8423_v53, %v8621_v23  ;;  %7524 = vmatprep.mubr.msk.f32.mxu0 %vm8198_vm2, %v8197_v51 }
 0x1ed   : > { %v908_v38 = vpop.f32.mrb[6].mxu1 }
 0x1ee   : > { %v8631_v41 = vmul.f32 %v8429_v2, %v908_v38  ;;  %v7446_v49 = vpop.f32.mrb[7].mxu1  ;;  %7518 = vmatpush3.msra.mxu1 %v1806_v8 }
 0x1ef   : > { %7520 = vmatmul.mubr.msk.f32.vlgmr.msra.gmra.mrb[26].mxu1 %vm226_vm1, %v8299_v9  ;;  %7527 = vmatprep.subr.mxu1 %v8197_v51 }
 0x1f0   : > { %v1807_v12 = vmul.f32 %v8429_v2, %v8631_v41  ;;  %v1346_v57 = vpop.f32.mrb[16].mxu0  ;;  %7529 = vmatprep.mubr.msk.f32.mxu1 %vm8198_vm2, %v8197_v51 }
 0x1f1   : > { %v981_v58 = vpop.f32.mrb[8].mxu1  ;;  %v7476_v63 = vpop.f32.mrb[17].mxu0 }
 0x1f2   : > { %v8641_v0 = vmul.f32 %v8431_v4, %v981_v58  ;;  %v7451_v55 = vpop.f32.mrb[9].mxu1  ;;  %7523 = vmatpush3.msra.mxu0 %v1807_v12 }
 0x1f3   : > { %7525 = vmatmul.mubr.msk.f32.vlgmr.msra.gmra.mrb[26].mxu0 %vm226_vm1, %v8310_v13  ;;  %7532 = vmatprep.subr.mxu0 %v8197_v51 }
 0x1f4   : > { %v1808_v9 = vmul.f32 %v8431_v4, %v8641_v0  ;;  %v1492_v7 = vpop.f32.mrb[18].mxu0  ;;  %7534 = vmatprep.mubr.msk.f32.mxu0 %vm8198_vm2, %v8197_v51 }
 0x1f5   : > { %v1054_v14 = vpop.f32.mrb[10].mxu1  ;;  %v7486_v16 = vpop.f32.mrb[19].mxu0 }
 0x1f6   : > { %v8651_v32 = vmul.f32 %v8434_v15, %v1054_v14  ;;  %v7456_v8 = vpop.f32.mrb[11].mxu1  ;;  %7528 = vmatpush3.msra.mxu1 %v1808_v9  ;;  %v8671_v9 = vmul.f32 %v8447_v50, %v1346_v57 }
 0x1f7   : > { %7530 = vmatmul.mubr.msk.f32.vlgmr.msra.gmra.mrb[28].mxu1 %vm226_vm1, %v8320_v18  ;;  %7537 = vmatprep.subr.mxu1 %v8197_v51 }
 0x1f8   : > { %v1809_v13 = vmul.f32 %v8434_v15, %v8651_v32  ;;  %v1638_v38 = vpop.f32.mrb[20].mxu0  ;;  %7539 = vmatprep.mubr.msk.f32.mxu1 %vm8198_vm2, %v8197_v51 }
 0x1f9   : > { %v1127_v49 = vpop.f32.mrb[12].mxu1  ;;  %v7496_v12 = vpop.f32.mrb[21].mxu0 }
 0x1fa   : > { %v8661_v58 = vmul.f32 %v8437_v26, %v1127_v49  ;;  %v7461_v63 = vpop.f32.mrb[13].mxu1  ;;  %7533 = vmatpush3.msra.mxu0 %v1809_v13  ;;  %v1813_v49 = vmul.f32 %v8447_v50, %v8671_v9  ;;  %v8686_v12 = vmul.f32 %v8472_v21, %v1492_v7 }
 0x1fb   : > { %7535 = vmatmul.mubr.msk.f32.vlgmr.msra.gmra.mrb[28].mxu0 %vm226_vm1, %v8324_v19  ;;  %7542 = vmatprep.subr.mxu0 %v8197_v51 }
 0x1fc   : > { %v1810_v18 = vmul.f32 %v8437_v26, %v8661_v58  ;;  %7544 = vmatprep.mubr.msk.f32.mxu0 %vm8198_vm2, %v8197_v51  ;;  %v1815_v7 = vmul.f32 %v8472_v21, %v8686_v12 }
 0x1fd   : > { %v1200_v55 = vpop.f32.mrb[14].mxu1 }
 0x1fe   : > { %v1784_v14 = vpop.f32.mrb[22].mxu0  ;;  %v8674_v16 = vmul.f32 %v8515_v5, %v1200_v55  ;;  %v7466_v8 = vpop.f32.mrb[15].mxu1  ;;  %7538 = vmatpush3.msra.mxu1 %v1810_v18 }
 0x1ff   : > { %7540 = vmatmul.mubr.msk.f32.vlgmr.msra.gmra.mrb[30].mxu1 %vm226_vm1, %v8334_v24  ;;  %7547 = vmatprep.subr.mxu1 %v8197_v51  ;;  %v7506_v19 = vpop.f32.mrb[23].mxu0  ;;  %v8702_v8 = vmul.f32 %v8503_v60, %v1638_v38 }
 0x200   : > { %v1811_v13 = vmul.f32 %v8515_v5, %v8674_v16  ;;  %7549 = vmatprep.mubr.msk.f32.mxu1 %vm8198_vm2, %v8197_v51 }
 0x201   : > { %v1273_v57 = vpop.f32.mrb[16].mxu1  ;;  %v1817_v38 = vmul.f32 %v8503_v60, %v8702_v8 }
 0x202   : > { %v8689_v63 = vmul.f32 %v8531_v17, %v1273_v57  ;;  %7543 = vmatpush3.msra.mxu0 %v1811_v13  ;;  %v7471_v24 = vpop.f32.mrb[17].mxu1 }
 0x203   : > { %7545 = vmatmul.mubr.msk.f32.vlgmr.msra.gmra.mrb[30].mxu0 %vm226_vm1, %v8338_v25  ;;  %7552 = vmatprep.subr.mxu0 %v8197_v51 }
 0x204   : > { %v1812_v18 = vmul.f32 %v8531_v17, %v8689_v63  ;;  %7553 = vmatpush3.msra.mxu0 %v1813_v49  ;;  %7554 = vmatprep.mubr.msk.f32.mxu0 %vm8198_vm2, %v8197_v51 }
 0x205   : > { %v1419_v55 = vpop.f32.mrb[18].mxu1  ;;  %7562 = vmatprep.subr.mxu0 %v8197_v51 }
 0x206   : > { %v8705_v25 = vmul.f32 %v8545_v27, %v1419_v55  ;;  %7548 = vmatpush3.msra.mxu1 %v1812_v18  ;;  %v7481_v19 = vpop.f32.mrb[19].mxu1 }
 0x207   : > { %7550 = vmatmul.mubr.msk.f32.vlgmr.msra.gmra.mrb[32].mxu1 %vm226_vm1, %v8348_v30  ;;  %7555 = vmatmul.mubr.msk.f32.vlgmr.msra.gmra.mrb[32].mxu0 %vm226_vm1, %v8352_v31  ;;  %v1803_v30 = vmul.f32 %v8538_v22, %v1784_v14 }
 0x208   : > { %v1814_v13 = vmul.f32 %v8545_v27, %v8705_v25  ;;  %7563 = vmatpush3.msra.mxu0 %v1815_v7  ;;  %7557 = vmatprep.subr.mxu1 %v8197_v51 }
 0x209   : > { %v1565_v57 = vpop.f32.mrb[20].mxu1  ;;  %7559 = vmatprep.mubr.msk.f32.mxu1 %vm8198_vm2, %v8197_v51  ;;  %7564 = vmatprep.mubr.msk.f32.mxu0 %vm8198_vm2, %v8197_v51  ;;  %v1819_v14 = vmul.f32 %v8538_v22, %v1803_v30 }
 0x20a   : > { %v1800_v31 = vmul.f32 %v8564_v39, %v1565_v57  ;;  %7558 = vmatpush3.msra.mxu1 %v1814_v13  ;;  %7572 = vmatprep.subr.mxu0 %v8197_v51  ;;  %v7491_v49 = vpop.f32.mrb[21].mxu1 }
 0x20b   : > { %7560 = vmatmul.mubr.msk.f32.vlgmr.msra.gmra.mrb[34].mxu1 %vm226_vm1, %v8362_v36  ;;  %7565 = vmatmul.mubr.msk.f32.vlgmr.msra.gmra.mrb[34].mxu0 %vm226_vm1, %v8366_v37  ;;  %v2957_v37 = vld [vmem:[%s9541_s2 + $0x18] sm:$0xff] }
 0x20c   : > { %v1816_v24 = vmul.f32 %v8564_v39, %v1800_v31  ;;  %7573 = vmatpush3.msra.mxu0 %v1817_v38  ;;  %7567 = vmatprep.subr.mxu1 %v8197_v51 }
 0x20d   : > { %v1711_v18 = vpop.f32.mrb[22].mxu1  ;;  %7569 = vmatprep.mubr.msk.f32.mxu1 %vm8198_vm2, %v8197_v51  ;;  %7574 = vmatprep.mubr.msk.f32.mxu0 %vm8198_vm2, %v8197_v51 }
 0x20e   : > { %v1802_v55 = vmul.f32 %v8580_v45, %v1711_v18  ;;  %7568 = vmatpush3.msra.mxu1 %v1816_v24  ;;  %7582 = vmatprep.subr.mxu0 %v8197_v51  ;;  %v7501_v36 = vpop.f32.mrb[23].mxu1 }
 0x20f   : > { %7570 = vmatmul.mubr.msk.f32.vlgmr.msra.gmra.mrb[36].mxu1 %vm226_vm1, %v8376_v42  ;;  %7575 = vmatmul.mubr.msk.f32.vlgmr.msra.gmra.mrb[36].mxu0 %vm226_vm1, %v8380_v43  ;;  %v2956_v42 = vld [vmem:[%s9541_s2 + $0x10] sm:$0xff]  ;;  %v3344_v43 = vld [vmem:[%s9541_s2 + $0x20] sm:$0xff] }
 0x210   : > { %v1818_v7 = vmul.f32 %v8580_v45, %v1802_v55  ;;  %7583 = vmatpush3.msra.mxu0 %v1819_v14  ;;  %7577 = vmatprep.subr.mxu1 %v8197_v51 }
 0x211   : > { %7579 = vmatprep.mubr.msk.f32.mxu1 %vm8198_vm2, %v8197_v51  ;;  %7584 = vmatprep.mubr.msk.f32.mxu0 %vm8198_vm2, %v8197_v51 }
 0x212   : > { %7578 = vmatpush3.msra.mxu1 %v1818_v7  ;;  %7587 = vmatprep.subr.mxu0 %v2957_v37 }
 0x213   : > { %7580 = vmatmul.mubr.msk.f32.vlgmr.msra.gmra.mrb[38].mxu1 %vm226_vm1, %v8389_v47  ;;  %7585 = vmatmul.mubr.msk.f32.vlgmr.msra.gmra.mrb[38].mxu0 %vm226_vm1, %v8393_v48 }
 0x214   : > { %7589 = vmatprep.mubr.msk.f32.mxu0 %vm226_vm1, %v8606_v61  ;;  %7624 = vmatprep.mubr.msk.f32.mxu1 %vm226_vm1, %v8493_v54 }
 0x215   : > { %7912 = vmatprep.subr.mxu1 %v2956_v42  ;;  %7588 = vmatpush3.msra.mxu0 %v2957_v37 }
 0x216   : > { %7913 = vmatpush3.msra.mxu1 %v2956_v42  ;;  %7613 = vmatprep.subr.mxu0 %v2956_v42 }
 0x217   : > { %7590 = vmatmul.mubr.msk.f32.vlgmr.msra.gmra.mrb[40].mxu0 %vm226_vm1, %v8611_v3  ;;  %7625 = vmatmul.mubr.msk.f32.vlgmr.msra.gmra.mrb[40].mxu1 %vm226_vm1, %v8523_v10 }
 0x218   : > { %7592 = vmatprep.mubr.msk.f32.mxu0 %vm226_vm1, %v8621_v23  ;;  %7627 = vmatprep.mubr.msk.f32.mxu1 %vm226_vm1, %v8535_v20 }
 0x219   : > { %7614 = vmatpush3.msra.mxu0 %v2956_v42  ;;  %7639 = vmatprep.subr.mxu1 %v3344_v43 }
 0x21a   : > { %7665 = vmatprep.subr.mxu0 %v8197_v51  ;;  %7640 = vmatpush3.msra.mxu1 %v3344_v43 }
 0x21b   : > { %7593 = vmatmul.mubr.msk.f32.gmra.mrb[42].mxu0 %vm226_vm1, %v8631_v41  ;;  %7628 = vmatmul.mubr.msk.f32.gmra.mrb[42].mxu1 %vm226_vm1, %v8485_v40 }
 0x21c   : > { %7595 = vmatprep.mubr.msk.f32.mxu0 %vm226_vm1, %v8641_v0  ;;  %7630 = vmatprep.mubr.msk.f32.mxu1 %vm226_vm1, %v8557_v33 }
 0x21d   : > { %7785 = vmatprep.subr.mxu1 %v8197_v51 }
 0x21f   : > { %7596 = vmatmul.mubr.msk.f32.gmra.mrb[44].mxu0 %vm226_vm1, %v8651_v32  ;;  %7631 = vmatmul.mubr.msk.f32.gmra.mrb[44].mxu1 %vm226_vm1, %v8496_v56 }
 0x220   : > { %7598 = vmatprep.mubr.msk.f32.mxu0 %vm226_vm1, %v8661_v58  ;;  %7633 = vmatprep.mubr.msk.f32.mxu1 %vm226_vm1, %v8570_v44 }
 0x223   : > { %7599 = vmatmul.mubr.msk.f32.gmra.mrb[46].mxu0 %vm226_vm1, %v8674_v16  ;;  %7634 = vmatmul.mubr.msk.f32.gmra.mrb[46].mxu1 %vm226_vm1, %v8518_v6 }
 0x224   : > { %7601 = vmatprep.mubr.msk.f32.mxu0 %vm226_vm1, %v8689_v63  ;;  %7636 = vmatprep.mubr.msk.f32.mxu1 %vm226_vm1, %v8586_v52 }
 0x227   : > { %7602 = vmatmul.mubr.msk.f32.gmra.mrb[48].mxu0 %vm226_vm1, %v8671_v9  ;;  %7637 = vmatmul.mubr.msk.f32.gmra.mrb[48].mxu1 %vm226_vm1, %v8551_v28 }
 0x228   : > { %7604 = vmatprep.mubr.msk.f32.mxu0 %vm226_vm1, %v8705_v25 }
 0x22b   : > { %7605 = vmatmul.mubr.msk.f32.gmra.mrb[50].mxu0 %vm226_vm1, %v8686_v12 }
 0x22c   : > { %7607 = vmatprep.mubr.msk.f32.mxu0 %vm226_vm1, %v1800_v31 }
 0x22f   : > { %7608 = vmatmul.mubr.msk.f32.gmra.mrb[52].mxu0 %vm226_vm1, %v8702_v8 }
 0x230   : > { %7610 = vmatprep.mubr.msk.f32.mxu0 %vm226_vm1, %v1802_v55 }
 0x233   : > { %7611 = vmatmul.mubr.msk.f32.gmra.mrb[54].mxu0 %vm226_vm1, %v1803_v30 }
 0x234   : > { %7615 = vmatprep.mubr.msk.f32.mxu0 %vm226_vm1, %v8442_v34 }
 0x237   : > { %7616 = vmatmul.mubr.msk.f32.vlgmr.msra.gmra.mrb[40].mxu0 %vm226_vm1, %v8439_v29 }
 0x238   : > { %7618 = vmatprep.mubr.msk.f32.mxu0 %vm226_vm1, %v8452_v59 }
 0x23b   : > { %7619 = vmatmul.mubr.msk.f32.gmra.mrb[42].mxu0 %vm226_vm1, %v8462_v1 }
 0x23c   : > { %7621 = vmatprep.mubr.msk.f32.mxu0 %vm226_vm1, %v8467_v11 }
 0x23f   : > { %7622 = vmatmul.mubr.msk.f32.gmra.mrb[44].mxu0 %vm226_vm1, %v8482_v35 }
 0x240   : > { %7667 = vmatprep.mubr.msk.f32.mxu0 %vm8198_vm2, %v8197_v51 }
 0x2ba   : > { %v1886_v47 = vpop.f32.mrb[24].mxu1 }
 0x2bb   : > { %v2940_v48 = vmul.f32 %v8420_v46, %v1886_v47  ;;  %v7511_v29 = vpop.f32.mrb[25].mxu1 }
 0x2bd   : > { %7641 = vmatprep.mubr.msk.f32.mxu1 %vm226_vm1, %v2940_v48 }
 0x2be   : > { %v1956_v34 = vpop.f32.mrb[24].mxu0 }
 0x2bf   : > { %v2941_v59 = vmul.f32 %v8426_v62, %v1956_v34  ;;  %v7516_v1 = vpop.f32.mrb[25].mxu0 }
 0x2c1   : > { %7642 = vmatmul.mubr.msk.f32.vlgmr.msra.gmra.mrb[50].mxu1 %vm226_vm1, %v2941_v59 }
 0x2c2   : > { %v2026_v11 = vpop.f32.mrb[26].mxu1 }
 0x2c3   : > { %v2942_v40 = vmul.f32 %v8423_v53, %v2026_v11  ;;  %v7521_v54 = vpop.f32.mrb[27].mxu1 }
 0x2c5   : > { %7644 = vmatprep.mubr.msk.f32.mxu1 %vm226_vm1, %v2942_v40 }
 0x2c6   : > { %v2096_v35 = vpop.f32.mrb[26].mxu0 }
 0x2c7   : > { %v2943_v56 = vmul.f32 %v8429_v2, %v2096_v35  ;;  %v7526_v6 = vpop.f32.mrb[27].mxu0 }
 0x2c9   : > { %7645 = vmatmul.mubr.msk.f32.gmra.mrb[52].mxu1 %vm226_vm1, %v2943_v56 }
 0x2ca   : > { %v2166_v10 = vpop.f32.mrb[28].mxu1 }
 0x2cb   : > { %v2944_v20 = vmul.f32 %v8431_v4, %v2166_v10  ;;  %v7531_v28 = vpop.f32.mrb[29].mxu1 }
 0x2cd   : > { %7647 = vmatprep.mubr.msk.f32.mxu1 %vm226_vm1, %v2944_v20 }
 0x2ce   : > { %v2236_v33 = vpop.f32.mrb[28].mxu0 }
 0x2cf   : > { %v2945_v44 = vmul.f32 %v8434_v15, %v2236_v33  ;;  %v7536_v52 = vpop.f32.mrb[29].mxu0 }
 0x2d1   : > { %7648 = vmatmul.mubr.msk.f32.gmra.mrb[54].mxu1 %vm226_vm1, %v2945_v44 }
 0x2d2   : > { %v2306_v61 = vpop.f32.mrb[30].mxu1 }
 0x2d3   : > { %v2946_v3 = vmul.f32 %v8437_v26, %v2306_v61  ;;  %v7541_v23 = vpop.f32.mrb[31].mxu1  ;;  %v8881_v61 = vld [vmem:[%s9541_s2 + $0x50] ss:$0 sm:$0xff] }
 0x2d5   : > { %7650 = vmatprep.mubr.msk.f32.mxu1 %vm226_vm1, %v2946_v3 }
 0x2d6   : > { %v2376_v41 = vpop.f32.mrb[30].mxu0 }
 0x2d7   : > { %v2947_v0 = vmul.f32 %v8515_v5, %v2376_v41  ;;  %v7546_v32 = vpop.f32.mrb[31].mxu0  ;;  %v8886_v41 = vld [vmem:[%s9541_s2 + $0x58] ss:$0 sm:$0xff] }
 0x2d9   : > { %7651 = vmatmul.mubr.msk.f32.gmra.mrb[40].mxu1 %vm226_vm1, %v2947_v0 }
 0x2da   : > { %v2446_v58 = vpop.f32.mrb[32].mxu1  ;;  %v2516_v9 = vpop.f32.mrb[32].mxu0 }
 0x2db   : > { %v2948_v16 = vmul.f32 %v8531_v17, %v2446_v58  ;;  %v2949_v12 = vmul.f32 %v8447_v50, %v2516_v9  ;;  %v7551_v63 = vpop.f32.mrb[33].mxu1  ;;  %v7556_v8 = vpop.f32.mrb[33].mxu0 }
 0x2dd   : > { %7653 = vmatprep.mubr.msk.f32.mxu1 %vm226_vm1, %v2948_v16 }
 0x2de   : > { %v2586_v25 = vpop.f32.mrb[34].mxu1  ;;  %v2656_v19 = vpop.f32.mrb[34].mxu0  ;;  %7654 = vmatmul.mubr.msk.f32.gmra.mrb[42].mxu1 %vm226_vm1, %v2949_v12 }
 0x2df   : > { %v2950_v13 = vmul.f32 %v8545_v27, %v2586_v25  ;;  %v2951_v57 = vmul.f32 %v8472_v21, %v2656_v19  ;;  %v7561_v38 = vpop.f32.mrb[35].mxu1  ;;  %v7566_v30 = vpop.f32.mrb[35].mxu0 }
 0x2e1   : > { %7656 = vmatprep.mubr.msk.f32.mxu1 %vm226_vm1, %v2950_v13 }
 0x2e2   : > { %v2726_v31 = vpop.f32.mrb[36].mxu1  ;;  %v2796_v49 = vpop.f32.mrb[36].mxu0  ;;  %7657 = vmatmul.mubr.msk.f32.gmra.mrb[44].mxu1 %vm226_vm1, %v2951_v57 }
 0x2e3   : > { %v2952_v24 = vmul.f32 %v8564_v39, %v2726_v31  ;;  %v2953_v18 = vmul.f32 %v8503_v60, %v2796_v49  ;;  %v7571_v14 = vpop.f32.mrb[37].mxu1  ;;  %v7576_v55 = vpop.f32.mrb[37].mxu0 }
 0x2e5   : > { %7659 = vmatprep.mubr.msk.f32.mxu1 %vm226_vm1, %v2952_v24  ;;  %v8910_v24 = vld [vmem:[%s8289_s8] sm:$0xff] }
 0x2e6   : > { %v2866_v36 = vpop.f32.mrb[38].mxu1  ;;  %v2936_v37 = vpop.f32.mrb[38].mxu0  ;;  %7660 = vmatmul.mubr.msk.f32.gmra.mrb[46].mxu1 %vm226_vm1, %v2953_v18 }
 0x2e7   : > { %v2954_v7 = vmul.f32 %v8580_v45, %v2866_v36  ;;  %v2955_v42 = vmul.f32 %v8538_v22, %v2936_v37  ;;  %v7586_v43 = vpop.f32.mrb[39].mxu0  ;;  %v7581_v47 = vpop.f32.mrb[39].mxu1 }
 0x2e9   : > { %7662 = vmatprep.mubr.msk.f32.mxu1 %vm226_vm1, %v2954_v7 }
 0x2ea   : > { %7663 = vmatmul.mubr.msk.f32.gmra.mrb[48].mxu1 %vm226_vm1, %v2955_v42  ;;  %v8924_v42 = vld [vmem:[%s8289_s8 + $0x8] sm:$0xff] }
 0x2eb   : > { %7787 = vmatprep.mubr.msk.f32.mxu1 %vm8198_vm2, %v8197_v51 }
 0x2f6   : > { %v8858_v48 = vpop.f32.mrb[46].mxu0 }
 0x2f7   : > { %v8860_v29 = vpop.f32.mrb[47].mxu0 }
 0x2fa   : > { %v8862_v34 = vpop.f32.mrb[48].mxu0 }
 0x2fb   : > { %v8864_v59 = vpop.f32.mrb[49].mxu0 }
 0x2fe   : > { %v8866_v1 = vpop.f32.mrb[50].mxu0 }
 0x2ff   : > { %v8868_v11 = vpop.f32.mrb[51].mxu0 }
 0x302   : > { %v8870_v40 = vpop.f32.mrb[52].mxu0 }
 0x303   : > { %v8872_v54 = vpop.f32.mrb[53].mxu0 }
 0x306   : > { %v8874_v35 = vpop.f32.mrb[54].mxu0 }
 0x307   : > { %v8876_v56 = vpop.f32.mrb[55].mxu0 }
 0x30a   : > { %v7617_v6 = vpop.f32.mrb[40].mxu0 }
 0x30b   : > { %v3265_v10 = vpop.f32.mrb[41].mxu0 }
 0x30e   : > { %v7620_v20 = vpop.f32.mrb[42].mxu0 }
 0x30f   : > { %v3275_v28 = vpop.f32.mrb[43].mxu0 }
 0x312   : > { %v7623_v33 = vpop.f32.mrb[44].mxu0 }
 0x313   : > { %v3285_v44 = vpop.f32.mrb[45].mxu0 }
 0x394   : > { %v7643_v52 = vpop.f32.mrb[50].mxu1 }
 0x395   : > { %v7914_v3 = vadd.f32 %v7643_v52, %v7617_v6  ;;  %v3459_v23 = vpop.f32.mrb[51].mxu1 }
 0x396   : > { %v7915_v0 = vadd.f32 %v3459_v23, %v3265_v10 }
 0x397   : > { %v3560_v32 = vmul.f32 %v7914_v3, %v8881_v61 }
 0x398   : > { %v3559_v58 = vmul.f32 %v7915_v0, %v8881_v61 }
 0x399   : > { %v8891_v9 = vadd.f32 %v8886_v41, %v3560_v32 }
 0x39a   : > { %v8894_v16 = vadd.f32 %v8886_v41, %v3559_v58  ;;  %v8957_v58 = vld [vmem:[%s8289_s8 + $0x18] sm:$0xff] }
 0x39b   : > { %v3597_v12 = vmax.f32 %v8891_v9, 0.0 }
 0x39c   : > { %v3596_v63 = vmax.f32 %v8894_v16, 0.0  ;;  %v7646_v8 = vpop.f32.mrb[52].mxu1 }
 0x39d   : > { %v7916_v25 = vadd.f32 %v7646_v8, %v7620_v20  ;;  %v3469_v19 = vpop.f32.mrb[53].mxu1  ;;  %v3613_v30 = vmul.f32 %v8426_v62, %v3597_v12 }
 0x39e   : > { %v3612_v13 = vmul.f32 %v8420_v46, %v3596_v63  ;;  %v7917_v57 = vadd.f32 %v3469_v19, %v3275_v28 }
 0x39f   : > { %v3562_v38 = vmul.f32 %v7916_v25, %v8881_v61 }
 0x3a0   : > { %v3561_v31 = vmul.f32 %v7917_v57, %v8881_v61  ;;  %7666 = vmatpush3.msra.mxu0 %v3612_v13 }
 0x3a1   : > { %v8907_v49 = vadd.f32 %v8886_v41, %v3562_v38  ;;  %7668 = vmatmul.mubr.msk.f32.vlgmr.msra.gmra.mrb[56].mxu0 %vm226_vm1, %v8910_v24  ;;  %7670 = vmatprep.subr.mxu0 %v8197_v51 }
 0x3a2   : > { %v8916_v18 = vadd.f32 %v8886_v41, %v3561_v31  ;;  %7671 = vmatpush3.msra.mxu0 %v3613_v30  ;;  %7672 = vmatprep.mubr.msk.f32.mxu0 %vm8198_vm2, %v8197_v51  ;;  %v8976_v30 = vld [vmem:[%s8289_s8 + $0x20] sm:$0xff] }
 0x3a3   : > { %7675 = vmatprep.subr.mxu0 %v8197_v51  ;;  %v3599_v14 = vmax.f32 %v8907_v49, 0.0 }
 0x3a4   : > { %v3598_v55 = vmax.f32 %v8916_v18, 0.0  ;;  %v7649_v36 = vpop.f32.mrb[54].mxu1 }
 0x3a5   : > { %v7918_v37 = vadd.f32 %v7649_v36, %v7623_v33  ;;  %v3479_v7 = vpop.f32.mrb[55].mxu1  ;;  %7673 = vmatmul.mubr.msk.f32.vlgmr.msra.gmra.mrb[58].mxu0 %vm226_vm1, %v8924_v42  ;;  %v3615_v10 = vmul.f32 %v8429_v2, %v3599_v14  ;;  %v8942_v33 = vld [vmem:[%s8289_s8 + $0x10] sm:$0xff] }
 0x3a6   : > { %v3614_v43 = vmul.f32 %v8423_v53, %v3598_v55  ;;  %v7919_v47 = vadd.f32 %v3479_v7, %v3285_v44  ;;  %7677 = vmatprep.mubr.msk.f32.mxu0 %vm8198_vm2, %v8197_v51 }
 0x3a7   : > { %v3564_v6 = vmul.f32 %v7918_v37, %v8881_v61 }
 0x3a8   : > { %v3563_v20 = vmul.f32 %v7919_v47, %v8881_v61  ;;  %7676 = vmatpush3.msra.mxu0 %v3614_v43 }
 0x3a9   : > { %v8939_v28 = vadd.f32 %v8886_v41, %v3564_v6  ;;  %7678 = vmatmul.mubr.msk.f32.vlgmr.msra.gmra.mrb[60].mxu0 %vm226_vm1, %v8942_v33  ;;  %7680 = vmatprep.subr.mxu0 %v8197_v51 }
 0x3aa   : > { %v8948_v44 = vadd.f32 %v8886_v41, %v3563_v20  ;;  %7681 = vmatpush3.msra.mxu0 %v3615_v10  ;;  %7682 = vmatprep.mubr.msk.f32.mxu0 %vm8198_vm2, %v8197_v51 }
 0x3ab   : > { %7685 = vmatprep.subr.mxu0 %v8197_v51  ;;  %v3601_v52 = vmax.f32 %v8939_v28, 0.0 }
 0x3ac   : > { %v3600_v3 = vmax.f32 %v8948_v44, 0.0  ;;  %v7652_v23 = vpop.f32.mrb[40].mxu1 }
 0x3ad   : > { %v7920_v0 = vadd.f32 %v7652_v23, %v8858_v48  ;;  %v3489_v32 = vpop.f32.mrb[41].mxu1  ;;  %7683 = vmatmul.mubr.msk.f32.vlgmr.msra.gmra.mrb[62].mxu0 %vm226_vm1, %v8957_v58  ;;  %v3617_v48 = vmul.f32 %v8434_v15, %v3601_v52 }
 0x3ae   : > { %v3616_v8 = vmul.f32 %v8431_v4, %v3600_v3  ;;  %v7921_v25 = vadd.f32 %v3489_v32, %v8860_v29  ;;  %7687 = vmatprep.mubr.msk.f32.mxu0 %vm8198_vm2, %v8197_v51 }
 0x3af   : > { %v3566_v19 = vmul.f32 %v7920_v0, %v8881_v61 }
 0x3b0   : > { %v3565_v13 = vmul.f32 %v7921_v25, %v8881_v61  ;;  %7686 = vmatpush3.msra.mxu0 %v3616_v8 }
 0x3b1   : > { %v8973_v57 = vadd.f32 %v8886_v41, %v3566_v19  ;;  %v7655_v38 = vpop.f32.mrb[42].mxu1  ;;  %7688 = vmatmul.mubr.msk.f32.vlgmr.msra.gmra.mrb[64].mxu0 %vm226_vm1, %v8976_v30  ;;  %7690 = vmatprep.subr.mxu0 %v8197_v51 }
 0x3b2   : > { %v8982_v29 = vadd.f32 %v8886_v41, %v3565_v13  ;;  %v7922_v31 = vadd.f32 %v7655_v38, %v8862_v34  ;;  %v3499_v36 = vpop.f32.mrb[43].mxu1  ;;  %7691 = vmatpush3.msra.mxu0 %v3617_v48  ;;  %7692 = vmatprep.mubr.msk.f32.mxu0 %vm8198_vm2, %v8197_v51  ;;  %v8994_v34 = vld [vmem:[%s8289_s8 + $0x28] sm:$0xff]  ;;  %v9017_v13 = vld [vmem:[%s8289_s8 + $0x30] sm:$0xff] }
 0x3b3   : > { %v7923_v37 = vadd.f32 %v3499_v36, %v8864_v59  ;;  %7695 = vmatprep.subr.mxu0 %v8197_v51  ;;  %v9551_v7 = vmax.f32 %v8973_v57, 0.0  ;;  %v9556_v16 = vmax.f32 %v8973_v57, 0.0 }
 0x3b4   : > { %v9552_v43 = vmax.f32 %v8982_v29, 0.0  ;;  %v3568_v47 = vmul.f32 %v7922_v31, %v8881_v61  ;;  %v9555_v9 = vmax.f32 %v8982_v29, 0.0 }
 0x3b5   : > { %v3567_v6 = vmul.f32 %v7923_v37, %v8881_v61  ;;  %v7658_v10 = vpop.f32.mrb[44].mxu1  ;;  %7693 = vmatmul.mubr.msk.f32.vlgmr.msra.gmra.mrb[66].mxu0 %vm226_vm1, %v8994_v34  ;;  %v3619_v8 = vmul.f32 %v8515_v5, %v9551_v7 }
 0x3b6   : > { %v3618_v59 = vmul.f32 %v8437_v26, %v9552_v43  ;;  %v7924_v20 = vadd.f32 %v7658_v10, %v8866_v1  ;;  %v3509_v23 = vpop.f32.mrb[45].mxu1  ;;  %7697 = vmatprep.mubr.msk.f32.mxu0 %vm8198_vm2, %v8197_v51  ;;  %v9012_v25 = vadd.f32 %v8886_v41, %v3568_v47  ;;  %v9036_v10 = vld [vmem:[%s8289_s8 + $0x38] sm:$0xff] }
 0x3b7   : > { %v9005_v0 = vadd.f32 %v8886_v41, %v3567_v6  ;;  %v7925_v32 = vadd.f32 %v3509_v23, %v8868_v11 }
 0x3b8   : > { %7696 = vmatpush3.msra.mxu0 %v3618_v59  ;;  %v9549_v37 = vmax.f32 %v9012_v25, 0.0  ;;  %v3570_v47 = vmul.f32 %v7924_v20, %v8881_v61 }
 0x3b9   : > { %v9550_v19 = vmax.f32 %v9005_v0, 0.0  ;;  %v3569_v1 = vmul.f32 %v7925_v32, %v8881_v61  ;;  %v7661_v48 = vpop.f32.mrb[46].mxu1  ;;  %7698 = vmatmul.mubr.msk.f32.vlgmr.msra.gmra.mrb[68].mxu0 %vm226_vm1, %v9017_v13  ;;  %7700 = vmatprep.subr.mxu0 %v8197_v51 }
 0x3ba   : > { %v7926_v11 = vadd.f32 %v7661_v48, %v8870_v40  ;;  %v3519_v38 = vpop.f32.mrb[47].mxu1  ;;  %7701 = vmatpush3.msra.mxu0 %v3619_v8  ;;  %7702 = vmatprep.mubr.msk.f32.mxu0 %vm8198_vm2, %v8197_v51  ;;  %v3621_v20 = vmul.f32 %v8447_v50, %v9549_v37  ;;  %v9049_v32 = vadd.f32 %v8886_v41, %v3570_v47 }
 0x3bb   : > { %v3620_v31 = vmul.f32 %v8531_v17, %v9550_v19  ;;  %v7927_v36 = vadd.f32 %v3519_v38, %v8872_v54  ;;  %7705 = vmatprep.subr.mxu0 %v8197_v51  ;;  %v9033_v40 = vadd.f32 %v8886_v41, %v3569_v1  ;;  %v9054_v1 = vld [vmem:[%s8289_s8 + $0x40] sm:$0xff] }
 0x3bc   : > { %v3572_v38 = vmul.f32 %v7926_v11, %v8881_v61  ;;  %v9560_v18 = vmax.f32 %v9049_v32, 0.0 }
 0x3bd   : > { %v7664_v6 = vpop.f32.mrb[48].mxu1  ;;  %7703 = vmatmul.mubr.msk.f32.vlgmr.msra.gmra.mrb[70].mxu0 %vm226_vm1, %v9036_v10  ;;  %v9548_v8 = vmax.f32 %v9033_v40, 0.0  ;;  %v9559_v49 = vmax.f32 %v9033_v40, 0.0 }
 0x3be   : > { %v7928_v59 = vadd.f32 %v7664_v6, %v8874_v35  ;;  %7706 = vmatpush3.msra.mxu0 %v3620_v31  ;;  %v3529_v54 = vpop.f32.mrb[49].mxu1  ;;  %7707 = vmatprep.mubr.msk.f32.mxu0 %vm8198_vm2, %v8197_v51  ;;  %v3571_v35 = vmul.f32 %v7927_v36, %v8881_v61  ;;  %v9070_v36 = vld [vmem:[%s8289_s8 + $0x48] sm:$0xff]  ;;  %v9081_v11 = vadd.f32 %v8886_v41, %v3572_v38 }
 0x3bf   : > { %v7929_v23 = vadd.f32 %v3529_v54, %v8876_v56  ;;  %7710 = vmatprep.subr.mxu0 %v8197_v51  ;;  %v9543_v56 = vmax.f32 %v9049_v32, 0.0  ;;  %v3622_v48 = vmul.f32 %v8545_v27, %v9548_v8 }
 0x3c0   : > { %v9067_v31 = vadd.f32 %v8886_v41, %v3571_v35  ;;  %v9544_v35 = vmax.f32 %v9081_v11, 0.0 }
 0x3c1   : > { %7708 = vmatmul.mubr.msk.f32.vlgmr.msra.gmra.mrb[72].mxu0 %vm226_vm1, %v9054_v1  ;;  %v3623_v47 = vmul.f32 %v8472_v21, %v9543_v56  ;;  %v3573_v54 = vmul.f32 %v7929_v23, %v8881_v61  ;;  %v3574_v23 = vmul.f32 %v7928_v59, %v8881_v61  ;;  %v9102_v56 = vld [vmem:[%s8289_s8 + $0x58] sm:$0xff] }
 0x3c2   : > { %7711 = vmatpush3.msra.mxu0 %v3621_v20  ;;  %7712 = vmatprep.mubr.msk.f32.mxu0 %vm8198_vm2, %v8197_v51  ;;  %v9547_v6 = vmax.f32 %v9067_v31, 0.0  ;;  %v9086_v20 = vld [vmem:[%s8289_s8 + $0x50] sm:$0xff] }
 0x3c3   : > { %7715 = vmatprep.subr.mxu0 %v8197_v51  ;;  %v9099_v38 = vadd.f32 %v8886_v41, %v3573_v54  ;;  %v9113_v61 = vadd.f32 %v8886_v41, %v3574_v23  ;;  %v9117_v54 = vld [vmem:[%s8289_s8 + $0x60] sm:$0xff]  ;;  %v9129_v23 = vld [vmem:[%s8289_s8 + $0x68] sm:$0xff] }
 0x3c5   : > { %7713 = vmatmul.mubr.msk.f32.vlgmr.msra.gmra.mrb[74].mxu0 %vm226_vm1, %v9070_v36  ;;  %v9546_v59 = vmax.f32 %v9099_v38, 0.0  ;;  %v9563_v28 = vmax.f32 %v9099_v38, 0.0  ;;  %v9564_v44 = vmax.f32 %v9113_v61, 0.0 }
 0x3c6   : > { %7716 = vmatpush3.msra.mxu0 %v3622_v48  ;;  %7717 = vmatprep.mubr.msk.f32.mxu0 %vm8198_vm2, %v8197_v51  ;;  %v3624_v48 = vmul.f32 %v8564_v39, %v9547_v6 }
 0x3c7   : > { %7720 = vmatprep.subr.mxu0 %v8197_v51  ;;  %v3626_v41 = vmul.f32 %v8580_v45, %v9546_v59 }
 0x3c9   : > { %7718 = vmatmul.mubr.msk.f32.vlgmr.msra.gmra.mrb[76].mxu0 %vm226_vm1, %v9086_v20 }
 0x3ca   : > { %7721 = vmatpush3.msra.mxu0 %v3623_v47  ;;  %7722 = vmatprep.mubr.msk.f32.mxu0 %vm8198_vm2, %v8197_v51  ;;  %v3625_v47 = vmul.f32 %v8503_v60, %v9544_v35  ;;  %v9140_v35 = vld [vmem:[%s8289_s8 + $0x70] sm:$0xff] }
 0x3cb   : > { %7725 = vmatprep.subr.mxu0 %v8197_v51 }
 0x3cd   : > { %7723 = vmatmul.mubr.msk.f32.vlgmr.msra.gmra.mrb[78].mxu0 %vm226_vm1, %v9102_v56 }
 0x3ce   : > { %7726 = vmatpush3.msra.mxu0 %v3624_v48  ;;  %7727 = vmatprep.mubr.msk.f32.mxu0 %vm8198_vm2, %v8197_v51  ;;  %v9545_v48 = vmax.f32 %v9113_v61, 0.0 }
 0x3cf   : > { %7730 = vmatprep.subr.mxu0 %v8197_v51 }
 0x3d1   : > { %7728 = vmatmul.mubr.msk.f32.vlgmr.msra.gmra.mrb[80].mxu0 %vm226_vm1, %v9117_v54 }
 0x3d2   : > { %7731 = vmatpush3.msra.mxu0 %v3625_v47  ;;  %7732 = vmatprep.mubr.msk.f32.mxu0 %vm8198_vm2, %v8197_v51  ;;  %v3627_v47 = vmul.f32 %v8538_v22, %v9545_v48 }
 0x3d3   : > { %7735 = vmatprep.subr.mxu0 %v8197_v51 }
 0x3d5   : > { %7733 = vmatmul.mubr.msk.f32.vlgmr.msra.gmra.mrb[82].mxu0 %vm226_vm1, %v9129_v23 }
 0x3d6   : > { %7736 = vmatpush3.msra.mxu0 %v3626_v41  ;;  %7737 = vmatprep.mubr.msk.f32.mxu0 %vm8198_vm2, %v8197_v51  ;;  %v9148_v41 = vld [vmem:[%s8289_s8 + $0x78] sm:$0xff]  ;;  %s8133_s8 = scalar_lea.vmem %s9491_s29, 256 }
 0x3d7   : > { %7740 = vmatprep.subr.mxu0 %v8197_v51  ;;  %p8134_p11 = scmp.ne.s32.totalorder %s9491_s29, %s8133_s8  ;;  %p8141_p1 = scmp.lt.s32.totalorder %s8139_s10, %s8133_s8 }
 0x3d9   : > { %7738 = vmatmul.mubr.msk.f32.vlgmr.msra.gmra.mrb[84].mxu0 %vm226_vm1, %v9140_v35  ;;  %p8135_p12 = pnand %p8134_p11, %p8260_p5  ;;  %p8142_p2 = por %p8141_p1, %p8140_p0 }
 0x3da   : > { %7741 = vmatpush3.msra.mxu0 %v3627_v47  ;;  %7742 = vmatprep.mubr.msk.f32.mxu0 %vm8198_vm2, %v8197_v51 }
 0x3db   : > { %7745 = vmatprep.subr.mxu0 %v8197_v51  ;;  %p8136_p13 = pneg %p8135_p12 }
 0x3dd   : > { %7743 = vmatmul.mubr.msk.f32.vlgmr.msra.gmra.mrb[86].mxu0 %vm226_vm1, %v9148_v41  ;;  %p8143_p3 = pnand %p8142_p2, %p8136_p13 }
 0x3de   : > { %7747 = vmatprep.mubr.msk.f32.mxu0 %vm8198_vm2, %v8197_v51 }
 0x474   : > { %v3694_v48 = vpop.f32.mrb[56].mxu0 }
 0x475   : > { %v9155_v59 = vmul.f32 %v8420_v46, %v3694_v48  ;;  %v7669_v6 = vpop.f32.mrb[57].mxu0 }
 0x477   : > { %v4764_v47 = vmul.f32 %v8420_v46, %v9155_v59 }
 0x478   : > { %v3764_v8 = vpop.f32.mrb[58].mxu0 }
 0x479   : > { %v9160_v37 = vmul.f32 %v8426_v62, %v3764_v8  ;;  %v7674_v19 = vpop.f32.mrb[59].mxu0  ;;  %7746 = vmatpush3.msra.mxu0 %v4764_v47 }
 0x47a   : > { %7748 = vmatmul.mubr.msk.f32.vlgmr.msra.gmra.mrb[88].mxu0 %vm226_vm1, %v8910_v24  ;;  %7750 = vmatprep.subr.mxu0 %v8197_v51 }
 0x47b   : > { %v4765_v7 = vmul.f32 %v8426_v62, %v9160_v37  ;;  %7752 = vmatprep.mubr.msk.f32.mxu0 %vm8198_vm2, %v8197_v51 }
 0x47c   : > { %v3834_v6 = vpop.f32.mrb[60].mxu0 }
 0x47d   : > { %v9170_v48 = vmul.f32 %v8423_v53, %v3834_v6  ;;  %v7679_v43 = vpop.f32.mrb[61].mxu0  ;;  %7751 = vmatpush3.msra.mxu0 %v4765_v7 }
 0x47e   : > { %7753 = vmatmul.mubr.msk.f32.vlgmr.msra.gmra.mrb[90].mxu0 %vm226_vm1, %v8924_v42  ;;  %7755 = vmatprep.subr.mxu0 %v8197_v51 }
 0x47f   : > { %v4766_v24 = vmul.f32 %v8423_v53, %v9170_v48  ;;  %7757 = vmatprep.mubr.msk.f32.mxu0 %vm8198_vm2, %v8197_v51 }
 0x480   : > { %v3904_v19 = vpop.f32.mrb[62].mxu0 }
 0x481   : > { %v9180_v8 = vmul.f32 %v8429_v2, %v3904_v19  ;;  %v7684_v47 = vpop.f32.mrb[63].mxu0  ;;  %7756 = vmatpush3.msra.mxu0 %v4766_v24 }
 0x482   : > { %7758 = vmatmul.mubr.msk.f32.vlgmr.msra.gmra.mrb[92].mxu0 %vm226_vm1, %v8942_v33  ;;  %7760 = vmatprep.subr.mxu0 %v8197_v51 }
 0x483   : > { %v4767_v42 = vmul.f32 %v8429_v2, %v9180_v8  ;;  %7762 = vmatprep.mubr.msk.f32.mxu0 %vm8198_vm2, %v8197_v51 }
 0x484   : > { %v3974_v7 = vpop.f32.mrb[64].mxu0 }
 0x485   : > { %v9190_v43 = vmul.f32 %v8431_v4, %v3974_v7  ;;  %v7689_v6 = vpop.f32.mrb[65].mxu0  ;;  %7761 = vmatpush3.msra.mxu0 %v4767_v42 }
 0x486   : > { %7763 = vmatmul.mubr.msk.f32.vlgmr.msra.gmra.mrb[94].mxu0 %vm226_vm1, %v8957_v58  ;;  %7765 = vmatprep.subr.mxu0 %v8197_v51 }
 0x487   : > { %v4768_v33 = vmul.f32 %v8431_v4, %v9190_v43  ;;  %7767 = vmatprep.mubr.msk.f32.mxu0 %vm8198_vm2, %v8197_v51 }
 0x488   : > { %v4044_v24 = vpop.f32.mrb[66].mxu0 }
 0x489   : > { %v9200_v19 = vmul.f32 %v8434_v15, %v4044_v24  ;;  %v7694_v47 = vpop.f32.mrb[67].mxu0  ;;  %7766 = vmatpush3.msra.mxu0 %v4768_v33 }
 0x48a   : > { %7768 = vmatmul.mubr.msk.f32.vlgmr.msra.gmra.mrb[96].mxu0 %vm226_vm1, %v8976_v30  ;;  %7770 = vmatprep.subr.mxu0 %v8197_v51 }
 0x48b   : > { %v4769_v58 = vmul.f32 %v8434_v15, %v9200_v19  ;;  %7772 = vmatprep.mubr.msk.f32.mxu0 %vm8198_vm2, %v8197_v51 }
 0x48c   : > { %v4114_v42 = vpop.f32.mrb[68].mxu0 }
 0x48d   : > { %v9210_v7 = vmul.f32 %v8437_v26, %v4114_v42  ;;  %v7699_v6 = vpop.f32.mrb[69].mxu0  ;;  %7771 = vmatpush3.msra.mxu0 %v4769_v58 }
 0x48e   : > { %7773 = vmatmul.mubr.msk.f32.vlgmr.msra.gmra.mrb[98].mxu0 %vm226_vm1, %v8994_v34  ;;  %7775 = vmatprep.subr.mxu0 %v8197_v51 }
 0x48f   : > { %v4770_v30 = vmul.f32 %v8437_v26, %v9210_v7  ;;  %7777 = vmatprep.mubr.msk.f32.mxu0 %vm8198_vm2, %v8197_v51 }
 0x490   : > { %v4184_v33 = vpop.f32.mrb[70].mxu0 }
 0x491   : > { %v9220_v24 = vmul.f32 %v8515_v5, %v4184_v33  ;;  %v7704_v47 = vpop.f32.mrb[71].mxu0  ;;  %7776 = vmatpush3.msra.mxu0 %v4770_v30 }
 0x492   : > { %7778 = vmatmul.mubr.msk.f32.vlgmr.msra.gmra.mrb[100].mxu0 %vm226_vm1, %v9017_v13  ;;  %7780 = vmatprep.subr.mxu0 %v8197_v51 }
 0x493   : > { %v4771_v34 = vmul.f32 %v8515_v5, %v9220_v24  ;;  %7782 = vmatprep.mubr.msk.f32.mxu0 %vm8198_vm2, %v8197_v51 }
 0x494   : > { %v4254_v58 = vpop.f32.mrb[72].mxu0 }
 0x495   : > { %v9230_v42 = vmul.f32 %v8531_v17, %v4254_v58  ;;  %v7709_v6 = vpop.f32.mrb[73].mxu0  ;;  %7781 = vmatpush3.msra.mxu0 %v4771_v34 }
 0x496   : > { %7783 = vmatmul.mubr.msk.f32.vlgmr.msra.gmra.mrb[102].mxu0 %vm226_vm1, %v9036_v10  ;;  %7790 = vmatprep.subr.mxu0 %v8197_v51 }
 0x497   : > { %v4772_v13 = vmul.f32 %v8531_v17, %v9230_v42  ;;  %7792 = vmatprep.mubr.msk.f32.mxu0 %vm8198_vm2, %v8197_v51 }
 0x498   : > { %v4324_v30 = vpop.f32.mrb[74].mxu0 }
 0x499   : > { %v9240_v33 = vmul.f32 %v8447_v50, %v4324_v30  ;;  %7786 = vmatpush3.msra.mxu1 %v4772_v13  ;;  %v7714_v47 = vpop.f32.mrb[75].mxu0 }
 0x49a   : > { %7788 = vmatmul.mubr.msk.f32.vlgmr.msra.gmra.mrb[56].mxu1 %vm226_vm1, %v9054_v1  ;;  %7795 = vmatprep.subr.mxu1 %v8197_v51 }
 0x49b   : > { %v4773_v10 = vmul.f32 %v8447_v50, %v9240_v33  ;;  %7797 = vmatprep.mubr.msk.f32.mxu1 %vm8198_vm2, %v8197_v51 }
 0x49c   : > { %v4394_v34 = vpop.f32.mrb[76].mxu0 }
 0x49d   : > { %v9250_v58 = vmul.f32 %v8545_v27, %v4394_v34  ;;  %7791 = vmatpush3.msra.mxu0 %v4773_v10  ;;  %v7719_v6 = vpop.f32.mrb[77].mxu0 }
 0x49e   : > { %7793 = vmatmul.mubr.msk.f32.vlgmr.msra.gmra.mrb[104].mxu0 %vm226_vm1, %v9070_v36  ;;  %7800 = vmatprep.subr.mxu0 %v8197_v51 }
 0x49f   : > { %v4774_v1 = vmul.f32 %v8545_v27, %v9250_v58  ;;  %7802 = vmatprep.mubr.msk.f32.mxu0 %vm8198_vm2, %v8197_v51 }
 0x4a0   : > { %v4464_v13 = vpop.f32.mrb[78].mxu0 }
 0x4a1   : > { %v4759_v30 = vmul.f32 %v8472_v21, %v4464_v13  ;;  %7796 = vmatpush3.msra.mxu1 %v4774_v1  ;;  %v7724_v47 = vpop.f32.mrb[79].mxu0 }
 0x4a2   : > { %7798 = vmatmul.mubr.msk.f32.vlgmr.msra.gmra.mrb[58].mxu1 %vm226_vm1, %v9086_v20  ;;  %7805 = vmatprep.subr.mxu1 %v8197_v51 }
 0x4a3   : > { %v4775_v36 = vmul.f32 %v8472_v21, %v4759_v30  ;;  %7807 = vmatprep.mubr.msk.f32.mxu1 %vm8198_vm2, %v8197_v51 }
 0x4a4   : > { %v4534_v10 = vpop.f32.mrb[80].mxu0 }
 0x4a5   : > { %v4760_v34 = vmul.f32 %v8564_v39, %v4534_v10  ;;  %7801 = vmatpush3.msra.mxu0 %v4775_v36  ;;  %v7729_v6 = vpop.f32.mrb[81].mxu0 }
 0x4a6   : > { %7803 = vmatmul.mubr.msk.f32.vlgmr.msra.gmra.mrb[106].mxu0 %vm226_vm1, %v9102_v56  ;;  %7810 = vmatprep.subr.mxu0 %v8197_v51 }
 0x4a7   : > { %v4776_v1 = vmul.f32 %v8564_v39, %v4760_v34  ;;  %7812 = vmatprep.mubr.msk.f32.mxu0 %vm8198_vm2, %v8197_v51 }
 0x4a8   : > { %v4604_v20 = vpop.f32.mrb[82].mxu0 }
 0x4a9   : > { %v4761_v13 = vmul.f32 %v8503_v60, %v4604_v20  ;;  %7806 = vmatpush3.msra.mxu1 %v4776_v1  ;;  %v7734_v47 = vpop.f32.mrb[83].mxu0 }
 0x4aa   : > { %7808 = vmatmul.mubr.msk.f32.vlgmr.msra.gmra.mrb[60].mxu1 %vm226_vm1, %v9117_v54  ;;  %7815 = vmatprep.subr.mxu1 %v8197_v51  ;;  %v5917_v54 = vld [vmem:[%s9541_s2 + $0x30] sm:$0xff] }
 0x4ab   : > { %v4777_v36 = vmul.f32 %v8503_v60, %v4761_v13  ;;  %7817 = vmatprep.mubr.msk.f32.mxu1 %vm8198_vm2, %v8197_v51 }
 0x4ac   : > { %v4674_v56 = vpop.f32.mrb[84].mxu0 }
 0x4ad   : > { %v4762_v10 = vmul.f32 %v8580_v45, %v4674_v56  ;;  %7811 = vmatpush3.msra.mxu0 %v4777_v36  ;;  %v7739_v6 = vpop.f32.mrb[85].mxu0 }
 0x4ae   : > { %7813 = vmatmul.mubr.msk.f32.vlgmr.msra.gmra.mrb[108].mxu0 %vm226_vm1, %v9129_v23  ;;  %7820 = vmatprep.subr.mxu0 %v8197_v51  ;;  %v5916_v23 = vld [vmem:[%s9541_s2 + $0x28] sm:$0xff] }
 0x4af   : > { %v4778_v1 = vmul.f32 %v8580_v45, %v4762_v10  ;;  %7822 = vmatprep.mubr.msk.f32.mxu0 %vm8198_vm2, %v8197_v51  ;;  %v6304_v51 = vld [vmem:[%s9541_s2 + $0x38] sm:$0xff] }
 0x4b0   : > { %v4744_v20 = vpop.f32.mrb[86].mxu0 }
 0x4b1   : > { %v4763_v47 = vmul.f32 %v8538_v22, %v4744_v20  ;;  %7816 = vmatpush3.msra.mxu1 %v4778_v1  ;;  %v7744_v36 = vpop.f32.mrb[87].mxu0 }
 0x4b2   : > { %7818 = vmatmul.mubr.msk.f32.vlgmr.msra.gmra.mrb[62].mxu1 %vm226_vm1, %v9140_v35  ;;  %7825 = vmatprep.subr.mxu1 %v5917_v54 }
 0x4b3   : > { %v4779_v56 = vmul.f32 %v8538_v22, %v4763_v47  ;;  %7827 = vmatprep.mubr.msk.f32.mxu1 %vm226_vm1, %v9155_v59  ;;  %7826 = vmatpush3.msra.mxu1 %v5917_v54 }
 0x4b4   : > { %7851 = vmatprep.subr.mxu1 %v5916_v23 }
 0x4b5   : > { %7821 = vmatpush3.msra.mxu0 %v4779_v56  ;;  %v9420_v56 = vld [vmem:[%s9541_s2 + $0x68] ss:$0 sm:$0xff] }
 0x4b6   : > { %7823 = vmatmul.mubr.msk.f32.vlgmr.msra.gmra.mrb[110].mxu0 %vm226_vm1, %v9148_v41  ;;  %7828 = vmatmul.mubr.msk.f32.vlgmr.msra.gmra.mrb[64].mxu1 %vm226_vm1, %v9160_v37 }
 0x4b7   : > { %7830 = vmatprep.mubr.msk.f32.mxu1 %vm226_vm1, %v9170_v48  ;;  %7852 = vmatpush3.msra.mxu1 %v5916_v23 }
 0x4b8   : > { %7877 = vmatprep.subr.mxu1 %v6304_v51 }
 0x4ba   : > { %7831 = vmatmul.mubr.msk.f32.gmra.mrb[66].mxu1 %vm226_vm1, %v9180_v8 }
 0x4bb   : > { %7833 = vmatprep.mubr.msk.f32.mxu1 %vm226_vm1, %v9190_v43 }
 0x4be   : > { %7834 = vmatmul.mubr.msk.f32.gmra.mrb[68].mxu1 %vm226_vm1, %v9200_v19 }
 0x4bf   : > { %7836 = vmatprep.mubr.msk.f32.mxu1 %vm226_vm1, %v9210_v7 }
 0x4c2   : > { %7837 = vmatmul.mubr.msk.f32.gmra.mrb[70].mxu1 %vm226_vm1, %v9220_v24 }
 0x4c3   : > { %7839 = vmatprep.mubr.msk.f32.mxu1 %vm226_vm1, %v9230_v42 }
 0x4c6   : > { %7840 = vmatmul.mubr.msk.f32.gmra.mrb[72].mxu1 %vm226_vm1, %v9240_v33 }
 0x4c7   : > { %7842 = vmatprep.mubr.msk.f32.mxu1 %vm226_vm1, %v9250_v58 }
 0x4ca   : > { %7843 = vmatmul.mubr.msk.f32.gmra.mrb[74].mxu1 %vm226_vm1, %v4759_v30 }
 0x4cb   : > { %7845 = vmatprep.mubr.msk.f32.mxu1 %vm226_vm1, %v4760_v34 }
 0x4ce   : > { %7846 = vmatmul.mubr.msk.f32.gmra.mrb[76].mxu1 %vm226_vm1, %v4761_v13 }
 0x4cf   : > { %7848 = vmatprep.mubr.msk.f32.mxu1 %vm226_vm1, %v4762_v10 }
 0x4d2   : > { %7849 = vmatmul.mubr.msk.f32.gmra.mrb[78].mxu1 %vm226_vm1, %v4763_v47 }
 0x4d3   : > { %7853 = vmatprep.mubr.msk.f32.mxu1 %vm226_vm1, %v3596_v63  ;;  %v9558_v63 = vmax.f32 %v9012_v25, 0.0 }
 0x4d6   : > { %7854 = vmatmul.mubr.msk.f32.vlgmr.msra.gmra.mrb[64].mxu1 %vm226_vm1, %v3597_v12  ;;  %v9557_v12 = vmax.f32 %v9005_v0, 0.0 }
 0x4d7   : > { %7856 = vmatprep.mubr.msk.f32.mxu1 %vm226_vm1, %v3598_v55  ;;  %7878 = vmatpush3.msra.mxu1 %v6304_v51  ;;  %v9562_v55 = vmax.f32 %v9081_v11, 0.0 }
 0x4da   : > { %7857 = vmatmul.mubr.msk.f32.gmra.mrb[66].mxu1 %vm226_vm1, %v3599_v14  ;;  %v9561_v14 = vmax.f32 %v9067_v31, 0.0 }
 0x4db   : > { %7859 = vmatprep.mubr.msk.f32.mxu1 %vm226_vm1, %v3600_v3 }
 0x4de   : > { %7860 = vmatmul.mubr.msk.f32.gmra.mrb[68].mxu1 %vm226_vm1, %v3601_v52 }
 0x4df   : > { %7862 = vmatprep.mubr.msk.f32.mxu1 %vm226_vm1, %v9555_v9 }
 0x4e2   : > { %7863 = vmatmul.mubr.msk.f32.gmra.mrb[70].mxu1 %vm226_vm1, %v9556_v16 }
 0x4e3   : > { %7865 = vmatprep.mubr.msk.f32.mxu1 %vm226_vm1, %v9557_v12 }
 0x4e6   : > { %7866 = vmatmul.mubr.msk.f32.gmra.mrb[72].mxu1 %vm226_vm1, %v9558_v63 }
 0x4e7   : > { %7868 = vmatprep.mubr.msk.f32.mxu1 %vm226_vm1, %v9559_v49 }
 0x4ea   : > { %7869 = vmatmul.mubr.msk.f32.gmra.mrb[74].mxu1 %vm226_vm1, %v9560_v18 }
 0x4eb   : > { %7871 = vmatprep.mubr.msk.f32.mxu1 %vm226_vm1, %v9561_v14 }
 0x4ee   : > { %7872 = vmatmul.mubr.msk.f32.gmra.mrb[76].mxu1 %vm226_vm1, %v9562_v55 }
 0x4ef   : > { %7874 = vmatprep.mubr.msk.f32.mxu1 %vm226_vm1, %v9563_v28 }
 0x4f2   : > { %7875 = vmatmul.mubr.msk.f32.gmra.mrb[78].mxu1 %vm226_vm1, %v9564_v44 }
 0x54d   : > { %v4846_v52 = vpop.f32.mrb[88].mxu0 }
 0x54e   : > { %v5900_v3 = vmul.f32 %v8420_v46, %v4846_v52  ;;  %v7749_v57 = vpop.f32.mrb[89].mxu0 }
 0x550   : > { %7879 = vmatprep.mubr.msk.f32.mxu1 %vm226_vm1, %v5900_v3 }
 0x551   : > { %v4916_v29 = vpop.f32.mrb[90].mxu0 }
 0x552   : > { %v5901_v0 = vmul.f32 %v8426_v62, %v4916_v29  ;;  %v7754_v25 = vpop.f32.mrb[91].mxu0 }
 0x554   : > { %7880 = vmatmul.mubr.msk.f32.vlgmr.msra.gmra.mrb[64].mxu1 %vm226_vm1, %v5901_v0 }
 0x555   : > { %v4986_v37 = vpop.f32.mrb[92].mxu0 }
 0x556   : > { %v5902_v40 = vmul.f32 %v8423_v53, %v4986_v37  ;;  %v7759_v32 = vpop.f32.mrb[93].mxu0 }
 0x558   : > { %7882 = vmatprep.mubr.msk.f32.mxu1 %vm226_vm1, %v5902_v40 }
 0x559   : > { %v5056_v31 = vpop.f32.mrb[94].mxu0 }
 0x55a   : > { %v5903_v11 = vmul.f32 %v8429_v2, %v5056_v31  ;;  %v7764_v35 = vpop.f32.mrb[95].mxu0 }
 0x55c   : > { %7883 = vmatmul.mubr.msk.f32.gmra.mrb[66].mxu1 %vm226_vm1, %v5903_v11 }
 0x55d   : > { %v5126_v46 = vpop.f32.mrb[96].mxu0 }
 0x55e   : > { %v5904_v38 = vmul.f32 %v8431_v4, %v5126_v46  ;;  %v7769_v61 = vpop.f32.mrb[97].mxu0 }
 0x560   : > { %7885 = vmatprep.mubr.msk.f32.mxu1 %vm226_vm1, %v5904_v38 }
 0x561   : > { %v5196_v62 = vpop.f32.mrb[98].mxu0 }
 0x562   : > { %v5905_v59 = vmul.f32 %v8434_v15, %v5196_v62  ;;  %v7774_v41 = vpop.f32.mrb[99].mxu0 }
 0x564   : > { %7886 = vmatmul.mubr.msk.f32.gmra.mrb[68].mxu1 %vm226_vm1, %v5905_v59 }
 0x565   : > { %v5266_v53 = vpop.f32.mrb[100].mxu0 }
 0x566   : > { %v5906_v48 = vmul.f32 %v8437_v26, %v5266_v53  ;;  %v7779_v8 = vpop.f32.mrb[101].mxu0 }
 0x568   : > { %7888 = vmatprep.mubr.msk.f32.mxu1 %vm226_vm1, %v5906_v48 }
 0x569   : > { %v5336_v2 = vpop.f32.mrb[102].mxu0 }
 0x56a   : > { %v5907_v43 = vmul.f32 %v8515_v5, %v5336_v2  ;;  %v7784_v19 = vpop.f32.mrb[103].mxu0 }
 0x56c   : > { %7889 = vmatmul.mubr.msk.f32.gmra.mrb[70].mxu1 %vm226_vm1, %v5907_v43 }
 0x56d   : > { %v5406_v4 = vpop.f32.mrb[56].mxu1 }
 0x56e   : > { %v5908_v7 = vmul.f32 %v8531_v17, %v5406_v4  ;;  %v7789_v24 = vpop.f32.mrb[57].mxu1 }
 0x570   : > { %7891 = vmatprep.mubr.msk.f32.mxu1 %vm226_vm1, %v5908_v7 }
 0x571   : > { %v5476_v15 = vpop.f32.mrb[104].mxu0 }
 0x572   : > { %v5909_v42 = vmul.f32 %v8447_v50, %v5476_v15  ;;  %v7794_v33 = vpop.f32.mrb[105].mxu0 }
 0x574   : > { %7892 = vmatmul.mubr.msk.f32.gmra.mrb[72].mxu1 %vm226_vm1, %v5909_v42 }
 0x575   : > { %v5546_v26 = vpop.f32.mrb[58].mxu1 }
 0x576   : > { %v5910_v58 = vmul.f32 %v8545_v27, %v5546_v26  ;;  %v7799_v30 = vpop.f32.mrb[59].mxu1 }
 0x578   : > { %7894 = vmatprep.mubr.msk.f32.mxu1 %vm226_vm1, %v5910_v58 }
 0x579   : > { %v5616_v5 = vpop.f32.mrb[106].mxu0 }
 0x57a   : > { %v5911_v34 = vmul.f32 %v8472_v21, %v5616_v5  ;;  %v7804_v13 = vpop.f32.mrb[107].mxu0 }
 0x57c   : > { %7895 = vmatmul.mubr.msk.f32.gmra.mrb[74].mxu1 %vm226_vm1, %v5911_v34 }
 0x57d   : > { %v5686_v17 = vpop.f32.mrb[60].mxu1 }
 0x57e   : > { %v5912_v10 = vmul.f32 %v8564_v39, %v5686_v17  ;;  %v7809_v6 = vpop.f32.mrb[61].mxu1  ;;  %v6721_v39 = vld [vmem:[%s9541_s2 + $0x40] sm:$0xff] }
 0x57f   : > { %7903 = vmatprep.subr.mxu0 %v6721_v39 }
 0x580   : > { %7897 = vmatprep.mubr.msk.f32.mxu1 %vm226_vm1, %v5912_v10  ;;  %7904 = vmatpush3.msra.mxu0 %v6721_v39 }
 0x581   : > { %v5756_v50 = vpop.f32.mrb[108].mxu0 }
 0x582   : > { %v5913_v1 = vmul.f32 %v8503_v60, %v5756_v50  ;;  %v7814_v54 = vpop.f32.mrb[109].mxu0  ;;  %v9415_v60 = vld [vmem:[%s9541_s2 + $0x60] ss:$0 sm:$0xff] }
 0x584   : > { %7898 = vmatmul.mubr.msk.f32.gmra.mrb[76].mxu1 %vm226_vm1, %v5913_v1 }
 0x585   : > { %v5826_v27 = vpop.f32.mrb[62].mxu1 }
 0x586   : > { %v5914_v20 = vmul.f32 %v8580_v45, %v5826_v27  ;;  %v7819_v47 = vpop.f32.mrb[63].mxu1 }
 0x588   : > { %7900 = vmatprep.mubr.msk.f32.mxu1 %vm226_vm1, %v5914_v20 }
 0x589   : > { %v5896_v21 = vpop.f32.mrb[110].mxu0 }
 0x58a   : > { %v5915_v36 = vmul.f32 %v8538_v22, %v5896_v21  ;;  %v7824_v23 = vpop.f32.mrb[111].mxu0 }
 0x58c   : > { %7901 = vmatmul.mubr.msk.f32.gmra.mrb[78].mxu1 %vm226_vm1, %v5915_v36 }
 0x627   : > { %v7881_v45 = vpop.f32.mrb[64].mxu1 }
 0x628   : > { %v6520_v22 = vmul.f32 %v7881_v45, %v9415_v60  ;;  %v6419_v51 = vpop.f32.mrb[65].mxu1 }
 0x629   : > { %v6519_v9 = vmul.f32 %v9415_v60, %v6419_v51 }
 0x62a   : > { %v6541_v16 = vadd.f32 %v9420_v56, %v6520_v22 }
 0x62b   : > { %v6540_v12 = vadd.f32 %v9420_v56, %v6519_v9 }
 0x62c   : > { %v6557_v63 = vmax.f32 %v6541_v16, 0.0 }
 0x62d   : > { %v6556_v49 = vmax.f32 %v6540_v12, 0.0 }
 0x62e   : > { %v6600_v18 = vsel %vm226_vm1, %v6557_v63, 0.0 }
 0x62f   : > { %v6601_v14 = vrot.slane %v6600_v18, 4  ;;  %v6593_v55 = vsel %vm226_vm1, %v6556_v49, 0.0  ;;  %v7884_v28 = vpop.f32.mrb[66].mxu1 }
 0x630   : > { %v6594_v44 = vrot.slane %v6593_v55, 4  ;;  %v6522_v52 = vmul.f32 %v7884_v28, %v9415_v60  ;;  %v6429_v3 = vpop.f32.mrb[67].mxu1 }
 0x631   : > { %v6602_v57 = vadd.f32 %v6601_v14, %v6600_v18  ;;  %v6521_v29 = vmul.f32 %v9415_v60, %v6429_v3 }
 0x632   : > { %v6595_v0 = vadd.f32 %v6594_v44, %v6593_v55  ;;  %v6543_v25 = vadd.f32 %v9420_v56, %v6522_v52 }
 0x633   : > { %v6603_v37 = vrot.slane %v6602_v57, 2  ;;  %v6542_v40 = vadd.f32 %v9420_v56, %v6521_v29 }
 0x634   : > { %v6596_v32 = vrot.slane %v6595_v0, 2  ;;  %v6559_v31 = vmax.f32 %v6543_v25, 0.0 }
 0x635   : > { %v6604_v11 = vadd.f32 %v6603_v37, %v6602_v57  ;;  %v6558_v35 = vmax.f32 %v6542_v40, 0.0 }
 0x636   : > { %v6597_v46 = vadd.f32 %v6596_v32, %v6595_v0  ;;  %v6614_v38 = vsel %vm226_vm1, %v6559_v31, 0.0 }
 0x637   : > { %v6605_v61 = vrot.slane %v6604_v11, 1  ;;  %v6615_v62 = vrot.slane %v6614_v38, 4  ;;  %v6607_v59 = vsel %vm226_vm1, %v6558_v35, 0.0  ;;  %v7887_v41 = vpop.f32.mrb[68].mxu1 }
 0x638   : > { %v6598_v53 = vrot.slane %v6597_v46, 1  ;;  %v6608_v48 = vrot.slane %v6607_v59, 4  ;;  %v6524_v8 = vmul.f32 %v7887_v41, %v9415_v60  ;;  %v6439_v2 = vpop.f32.mrb[69].mxu1 }
 0x639   : > { %v6606_v43 = vadd.f32 %v6605_v61, %v6604_v11  ;;  %v6616_v19 = vadd.f32 %v6615_v62, %v6614_v38  ;;  %v6523_v4 = vmul.f32 %v9415_v60, %v6439_v2 }
 0x63a   : > { %v6599_v7 = vadd.f32 %v6598_v53, %v6597_v46  ;;  %v6609_v24 = vadd.f32 %v6608_v48, %v6607_v59  ;;  %v6545_v15 = vadd.f32 %v9420_v56, %v6524_v8 }
 0x63b   : > { %v6706_v42 = vmul.f32 0.125, %v6606_v43  ;;  %v6617_v33 = vrot.slane %v6616_v19, 2  ;;  %v6544_v26 = vadd.f32 %v9420_v56, %v6523_v4 }
 0x63c   : > { %v6705_v58 = vmul.f32 0.125, %v6599_v7  ;;  %v6610_v30 = vrot.slane %v6609_v24, 2  ;;  %v6561_v5 = vmax.f32 %v6545_v15, 0.0 }
 0x63d   : > { %v6618_v34 = vadd.f32 %v6617_v33, %v6616_v19  ;;  %v6560_v13 = vmax.f32 %v6544_v26, 0.0 }
 0x63e   : > { %v6744_v17 = vsel %vm6743_vm3, %v6706_v42, %v6705_v58  ;;  %v6611_v10 = vadd.f32 %v6610_v30, %v6609_v24  ;;  %v6628_v6 = vsel %vm226_vm1, %v6561_v5, 0.0 }
 0x63f   : > { %v6619_v50 = vrot.slane %v6618_v34, 1  ;;  %v6629_v1 = vrot.slane %v6628_v6, 4  ;;  %v6621_v54 = vsel %vm226_vm1, %v6560_v13, 0.0  ;;  %v7890_v27 = vpop.f32.mrb[70].mxu1 }
 0x640   : > { %v6612_v20 = vrot.slane %v6611_v10, 1  ;;  %v6622_v47 = vrot.slane %v6621_v54, 4  ;;  %v6526_v21 = vmul.f32 %v7890_v27, %v9415_v60  ;;  %v6449_v36 = vpop.f32.mrb[71].mxu1 }
 0x641   : > { %v6620_v23 = vadd.f32 %v6619_v50, %v6618_v34  ;;  %v6630_v39 = vadd.f32 %v6629_v1, %v6628_v6  ;;  %v6525_v45 = vmul.f32 %v9415_v60, %v6449_v36 }
 0x642   : > { %v6613_v22 = vadd.f32 %v6612_v20, %v6611_v10  ;;  %v6623_v51 = vadd.f32 %v6622_v47, %v6621_v54  ;;  %v6547_v9 = vadd.f32 %v9420_v56, %v6526_v21 }
 0x643   : > { %v6631_v16 = vrot.slane %v6630_v39, 2  ;;  %v6546_v12 = vadd.f32 %v9420_v56, %v6525_v45  ;;  %v6708_v14 = vmul.f32 0.125, %v6620_v23 }
 0x644   : > { %v6707_v63 = vmul.f32 0.125, %v6613_v22  ;;  %v6624_v49 = vrot.slane %v6623_v51, 2  ;;  %v6563_v18 = vmax.f32 %v6547_v9, 0.0 }
 0x645   : > { %v6632_v55 = vadd.f32 %v6631_v16, %v6630_v39  ;;  %v6562_v28 = vmax.f32 %v6546_v12, 0.0 }
 0x646   : > { %v6625_v44 = vadd.f32 %v6624_v49, %v6623_v51  ;;  %v6642_v52 = vsel %vm226_vm1, %v6563_v18, 0.0  ;;  %v6746_v3 = vsel %vm6745_vm4, %v6707_v63, %v6744_v17 }
 0x647   : > { %v6633_v57 = vrot.slane %v6632_v55, 1  ;;  %v6643_v29 = vrot.slane %v6642_v52, 4  ;;  %v6635_v0 = vsel %vm226_vm1, %v6562_v28, 0.0  ;;  %v7893_v25 = vpop.f32.mrb[72].mxu1  ;;  %v6748_v37 = vsel %vm6747_vm5, %v6708_v14, %v6746_v3 }
 0x648   : > { %v6626_v40 = vrot.slane %v6625_v44, 1  ;;  %v6636_v32 = vrot.slane %v6635_v0, 4  ;;  %v6528_v31 = vmul.f32 %v7893_v25, %v9415_v60  ;;  %v6459_v11 = vpop.f32.mrb[73].mxu1 }
 0x649   : > { %v6634_v35 = vadd.f32 %v6633_v57, %v6632_v55  ;;  %v6644_v46 = vadd.f32 %v6643_v29, %v6642_v52  ;;  %v6527_v38 = vmul.f32 %v9415_v60, %v6459_v11 }
 0x64a   : > { %v6627_v61 = vadd.f32 %v6626_v40, %v6625_v44  ;;  %v6637_v62 = vadd.f32 %v6636_v32, %v6635_v0  ;;  %v6549_v59 = vadd.f32 %v9420_v56, %v6528_v31 }
 0x64b   : > { %v6645_v41 = vrot.slane %v6644_v46, 2  ;;  %v6548_v53 = vadd.f32 %v9420_v56, %v6527_v38  ;;  %v6710_v43 = vmul.f32 0.125, %v6634_v35 }
 0x64c   : > { %v6709_v48 = vmul.f32 0.125, %v6627_v61  ;;  %v6638_v8 = vrot.slane %v6637_v62, 2  ;;  %v6565_v2 = vmax.f32 %v6549_v59, 0.0 }
 0x64d   : > { %v6646_v19 = vadd.f32 %v6645_v41, %v6644_v46  ;;  %v6564_v4 = vmax.f32 %v6548_v53, 0.0 }
 0x64e   : > { %v6639_v7 = vadd.f32 %v6638_v8, %v6637_v62  ;;  %v6656_v24 = vsel %vm226_vm1, %v6565_v2, 0.0  ;;  %v6750_v15 = vsel %vm6749_vm6, %v6709_v48, %v6748_v37 }
 0x64f   : > { %v6647_v42 = vrot.slane %v6646_v19, 1  ;;  %v6657_v33 = vrot.slane %v6656_v24, 4  ;;  %v6649_v26 = vsel %vm226_vm1, %v6564_v4, 0.0  ;;  %v7896_v58 = vpop.f32.mrb[74].mxu1  ;;  %v6752_v30 = vsel %vm6751_vm7, %v6710_v43, %v6750_v15 }
 0x650   : > { %v6640_v5 = vrot.slane %v6639_v7, 1  ;;  %v6650_v34 = vrot.slane %v6649_v26, 4  ;;  %v6530_v13 = vmul.f32 %v7896_v58, %v9415_v60  ;;  %v6469_v17 = vpop.f32.mrb[75].mxu1 }
 0x651   : > { %v6658_v10 = vadd.f32 %v6657_v33, %v6656_v24  ;;  %v6529_v6 = vmul.f32 %v9415_v60, %v6469_v17  ;;  %v6648_v50 = vadd.f32 %v6647_v42, %v6646_v19 }
 0x652   : > { %v6641_v1 = vadd.f32 %v6640_v5, %v6639_v7  ;;  %v6651_v54 = vadd.f32 %v6650_v34, %v6649_v26  ;;  %v6551_v27 = vadd.f32 %v9420_v56, %v6530_v13 }
 0x653   : > { %v6659_v20 = vrot.slane %v6658_v10, 2  ;;  %v6550_v47 = vadd.f32 %v9420_v56, %v6529_v6  ;;  %v6712_v22 = vmul.f32 0.125, %v6648_v50 }
 0x654   : > { %v6652_v21 = vrot.slane %v6651_v54, 2  ;;  %v6567_v36 = vmax.f32 %v6551_v27, 0.0  ;;  %v6711_v23 = vmul.f32 0.125, %v6641_v1 }
 0x655   : > { %v6660_v39 = vadd.f32 %v6659_v20, %v6658_v10  ;;  %v6566_v45 = vmax.f32 %v6550_v47, 0.0 }
 0x656   : > { %v6653_v51 = vadd.f32 %v6652_v21, %v6651_v54  ;;  %v6670_v9 = vsel %vm226_vm1, %v6567_v36, 0.0  ;;  %v6754_v16 = vsel %vm6753_vm8, %v6711_v23, %v6752_v30 }
 0x657   : > { %v6661_v12 = vrot.slane %v6660_v39, 1  ;;  %v6671_v63 = vrot.slane %v6670_v9, 4  ;;  %v6663_v49 = vsel %vm226_vm1, %v6566_v45, 0.0  ;;  %v7899_v18 = vpop.f32.mrb[76].mxu1  ;;  %v6756_v14 = vsel %vm6755_vm9, %v6712_v22, %v6754_v16 }
 0x658   : > { %v6654_v55 = vrot.slane %v6653_v51, 1  ;;  %v6664_v28 = vrot.slane %v6663_v49, 4  ;;  %v6532_v44 = vmul.f32 %v7899_v18, %v9415_v60  ;;  %v6479_v52 = vpop.f32.mrb[77].mxu1  ;;  %7905 = vmatprep.mubr.msk.f32.mxu0 %vm226_vm1, %v6756_v14 }
 0x659   : > { %v6662_v3 = vadd.f32 %v6661_v12, %v6660_v39  ;;  %v6672_v57 = vadd.f32 %v6671_v63, %v6670_v9  ;;  %v6531_v29 = vmul.f32 %v9415_v60, %v6479_v52 }
 0x65a   : > { %v6655_v0 = vadd.f32 %v6654_v55, %v6653_v51  ;;  %v6665_v25 = vadd.f32 %v6664_v28, %v6663_v49  ;;  %v6553_v37 = vadd.f32 %v9420_v56, %v6532_v44 }
 0x65b   : > { %v6714_v40 = vmul.f32 0.125, %v6662_v3  ;;  %v6673_v32 = vrot.slane %v6672_v57, 2  ;;  %v6552_v31 = vadd.f32 %v9420_v56, %v6531_v29 }
 0x65c   : > { %v6713_v11 = vmul.f32 0.125, %v6655_v0  ;;  %v6666_v35 = vrot.slane %v6665_v25, 2  ;;  %v6569_v46 = vmax.f32 %v6553_v37, 0.0 }
 0x65d   : > { %v6674_v38 = vadd.f32 %v6673_v32, %v6672_v57  ;;  %v6568_v61 = vmax.f32 %v6552_v31, 0.0 }
 0x65e   : > { %v6757_v62 = vsel %vm6743_vm3, %v6714_v40, %v6713_v11  ;;  %v6667_v59 = vadd.f32 %v6666_v35, %v6665_v25  ;;  %v6684_v41 = vsel %vm226_vm1, %v6569_v46, 0.0  ;;  %v7139_v25 = vld [vmem:[%s9541_s2 + $0x70] ss:$0 sm:$0xff] }
 0x65f   : > { %v6675_v53 = vrot.slane %v6674_v38, 1  ;;  %v6685_v48 = vrot.slane %v6684_v41, 4  ;;  %v6677_v8 = vsel %vm226_vm1, %v6568_v61, 0.0  ;;  %v7902_v2 = vpop.f32.mrb[78].mxu1 }
 0x660   : > { %v6668_v43 = vrot.slane %v6667_v59, 1  ;;  %v6678_v19 = vrot.slane %v6677_v8, 4  ;;  %v6534_v4 = vmul.f32 %v7902_v2, %v9415_v60  ;;  %v6489_v7 = vpop.f32.mrb[79].mxu1 }
 0x661   : > { %v6676_v24 = vadd.f32 %v6675_v53, %v6674_v38  ;;  %v6686_v15 = vadd.f32 %v6685_v48, %v6684_v41  ;;  %v6533_v42 = vmul.f32 %v9415_v60, %v6489_v7 }
 0x662   : > { %v6669_v33 = vadd.f32 %v6668_v43, %v6667_v59  ;;  %v6679_v26 = vadd.f32 %v6678_v19, %v6677_v8  ;;  %v6555_v58 = vadd.f32 %v9420_v56, %v6534_v4 }
 0x663   : > { %v6687_v30 = vrot.slane %v6686_v15, 2  ;;  %v6554_v5 = vadd.f32 %v9420_v56, %v6533_v42  ;;  %v6716_v10 = vmul.f32 0.125, %v6676_v24 }
 0x664   : > { %v6715_v34 = vmul.f32 0.125, %v6669_v33  ;;  %v6680_v13 = vrot.slane %v6679_v26, 2  ;;  %v6571_v17 = vmax.f32 %v6555_v58, 0.0 }
 0x665   : > { %v6688_v6 = vadd.f32 %v6687_v30, %v6686_v15  ;;  %v6570_v50 = vmax.f32 %v6554_v5, 0.0 }
 0x666   : > { %v6758_v1 = vsel %vm6745_vm4, %v6715_v34, %v6757_v62  ;;  %v6681_v54 = vadd.f32 %v6680_v13, %v6679_v26  ;;  %v6698_v27 = vsel %vm226_vm1, %v6571_v17, 0.0 }
 0x667   : > { %v6689_v20 = vrot.slane %v6688_v6, 1  ;;  %v6699_v60 = vrot.slane %v6698_v27, 4  ;;  %v6691_v47 = vsel %vm226_vm1, %v6570_v50, 0.0  ;;  %v6759_v21 = vsel %vm6747_vm5, %v6716_v10, %v6758_v1 }
 0x668   : > { %v6682_v36 = vrot.slane %v6681_v54, 1  ;;  %v6692_v23 = vrot.slane %v6691_v47, 4 }
 0x669   : > { %v6690_v56 = vadd.f32 %v6689_v20, %v6688_v6  ;;  %v6700_v39 = vadd.f32 %v6699_v60, %v6698_v27 }
 0x66a   : > { %v6683_v45 = vadd.f32 %v6682_v36, %v6681_v54  ;;  %v6693_v22 = vadd.f32 %v6692_v23, %v6691_v47 }
 0x66b   : > { %v6701_v51 = vrot.slane %v6700_v39, 2  ;;  %v6718_v12 = vmul.f32 0.125, %v6690_v56 }
 0x66c   : > { %v6717_v9 = vmul.f32 0.125, %v6683_v45  ;;  %v6694_v16 = vrot.slane %v6693_v22, 2 }
 0x66d   : > { %v6702_v63 = vadd.f32 %v6701_v51, %v6700_v39 }
 0x66e   : > { %v6695_v49 = vadd.f32 %v6694_v16, %v6693_v22  ;;  %v6760_v18 = vsel %vm6749_vm6, %v6717_v9, %v6759_v21 }
 0x66f   : > { %v6703_v14 = vrot.slane %v6702_v63, 1  ;;  %v6761_v55 = vsel %vm6751_vm7, %v6718_v12, %v6760_v18 }
 0x670   : > { %v6696_v28 = vrot.slane %v6695_v49, 1 }
 0x671   : > { %v6704_v44 = vadd.f32 %v6703_v14, %v6702_v63 }
 0x672   : > { %v6697_v52 = vadd.f32 %v6696_v28, %v6695_v49 }
 0x673   : > { %v6720_v57 = vmul.f32 0.125, %v6704_v44 }
 0x674   : > { %v6719_v3 = vmul.f32 0.125, %v6697_v52 }
 0x676   : > { %v6762_v29 = vsel %vm6753_vm8, %v6719_v3, %v6761_v55 }
 0x677   : > { %v6763_v0 = vsel %vm6755_vm9, %v6720_v57, %v6762_v29 }
 0x678   : > { %7906 = vmatmul.mubr.msk.f32.vlgmr.msra.gmra.mrb[112].mxu0 %vm226_vm1, %v6763_v0 }
 0x74b   : > { %v7907_v37 = vpop.f32.mrb[112].mxu0 }
 0x74c   : > { %v6840_v40 = vadd.f32 %v7907_v37, %v7139_v25  ;;  %v6834_v32 = vpop.f32.mrb[113].mxu0 }
 0x74d   : > { %v6835_v31 = vadd.f32 %v7139_v25, %v6834_v32 }
 0x74e   : > { %6844 = vst [vmem:[%s180_s28 + $0x8] sm:$0xff] %v6840_v40 }
 0x74f   : > { %6843 = vst [vmem:[%s180_s28] sm:$0xff] %v6835_v31 }
 0x750   : > { %8146 = shalt.err (!%p8143_p3)
}
 0x751   : > { %s8147_s11 = scalar_lea.hbm %s9496_s6, 256  ;;  %s8151_s20 = scalar_lea.hbm %s9542_s3, 768 }
 0x752   : > { %p8148_p4 = scmp.ne.s32.totalorder %s9496_s6, %s8147_s11  ;;  %p8152_p9 = scmp.lt.u32.totalorder %s9496_s6, %s9542_s3 }
 0x753   : > { %p8153_p10 = scmp.lt.u32.totalorder %s8151_s20, %s8147_s11  ;;  %p8155_p12 = scmp.lt.u32.totalorder %s8147_s11, %s9496_s6 }
 0x754   : > { %p8149_p7 = pnand %p8148_p4, %p8260_p5 }
 0x755   : > { %p8154_p11 = por %p8153_p10, %p8152_p9 }
 0x756   : > { %p8150_p8 = pneg %p8149_p7 }
 0x757   : > { %p8156_p13 = por %p8155_p12, %p8154_p11 }
 0x759   : > { %p8157_p0 = pnand %p8156_p13, %p8150_p8 }
 0x75b   : > { %8160 = shalt.err (!%p8157_p0)
}
 0x75c   : > { %s8200_s26 = smov 128   ;;  %s8201_s27 = smov 8  }
 0x75d   : > { %7978 = dma.vmem_to_hbm [thread:$0]  (%p8260_p5), %s9491_s29, 256, %s9496_s6, %s9498_s7, %s8200_s26, %s8200_s26, %s8201_s27  }
 0x75e PF: > { %p7984_p1 = scmp.ge.s32.totalorder %s8195_s15, 2  ;;  %s6874_s28 = sand.u32 1, %s8183_s12  }
 0x75f   : > { %s6875_s30 = scalar_lea.sflag [#allocation3], %s6874_s28 }
 0x760   : > { %p7981_p2 = pnand %p7984_p1, %p8264_p6 }
 0x762   : > { %8178 = dma.done.wait (!%p7981_p2), %s6875_s30, 256  }
 0x763   : > { %8180 = vsyncadd (!%p7981_p2), %s6875_s30, 4294967040  ;;  %p13_p3 = scmp.ge.s32.totalorder %s8247_s18, 5   ;;  %s9565_s12 = smov %s8187_s13 }
 0x764   : > { %s9566_s13 = smov %s8191_s14  ;;  %s9567_s14 = smov %s8258_s21 }
 0x765   : > { %s9568_s15 = smov %s8247_s18  ;;  %15 = sbr.rel (!%p13_p3) target bundleno = 3 (0x3), region = 70 }
 0x76c   :  { %6880 = vsyncpa [#allocation3], 1 }
 0x76d   :  { %6882 = vsyncpa [#allocation3 + $0x1], 1 }

</bundles_post_ra>
